<compile_context>
chip_gen: v7x
topology: tpu7x:2x2x1
jax: 0.10.0
libtpu: 0.0.40
codegen_flags: <defaults>
</compile_context>

<pallas_src>
import functools

import jax
import jax.numpy as jnp
from jax.experimental import pallas as pl
from jax.experimental.pallas import tpu as pltpu


def _kpm_loss_kernel(r_p2, r_n2, lane_extent, n_valid,
                     pts_ref, knn_ref, logits_ref, transform_ref, part_ref):
    i = pl.program_id(0)
    K = logits_ref.shape[0]
    tl = logits_ref.shape[2]
    f32 = jnp.float32

    # Rigid-transform scalars (SMEM), hoisted once.
    r00, r01, r02, t0 = (transform_ref[j] for j in range(0, 4))
    r10, r11, r12, t1 = (transform_ref[j] for j in range(4, 8))
    r20, r21, r22, t2 = (transform_ref[j] for j in range(8, 12))

    # Per-point channels, each (8, tl): rows 0-2 tgt corres, 3-5 src xyz, 6 score.
    cx, cy, cz = pts_ref[0], pts_ref[1], pts_ref[2]
    sx, sy, sz = pts_ref[3], pts_ref[4], pts_ref[5]
    score = pts_ref[6]

    # apply_transform: p' = R p + t
    stx = sx * r00 + sy * r01 + sz * r02 + t0
    sty = sx * r10 + sy * r11 + sz * r12 + t1
    stz = sx * r20 + sy * r21 + sz * r22 + t2

    # Validity of packed point p = sublane * lane_extent + (i * tl + lane).
    sub = jax.lax.broadcasted_iota(jnp.int32, (8, tl), 0)
    lane = jax.lax.broadcasted_iota(jnp.int32, (8, tl), 1)
    p = sub * lane_extent + (i * tl + lane)
    valid = (p < n_valid).astype(f32)

    # Squared distances to the K grouped target points (bf16 storage upcast here;
    # thresholds compare squared distances -> no (K, 8, tl) sqrt).
    knn_x = knn_ref[0].astype(f32)          # (K, 8, tl)
    knn_y = knn_ref[1].astype(f32)
    knn_z = knn_ref[2].astype(f32)
    logits = logits_ref[...].astype(f32)    # (K, 8, tl)

    dsq = []
    for k in range(K):                      # K small & static: unrolled 2-D elementwise ops
        dx = stx - knn_x[k]
        dy = sty - knn_y[k]
        dz = stz - knn_z[k]
        dsq.append(dx * dx + dy * dy + dz * dz)

    dist1_sq = dsq[0]
    for k in range(1, K):
        dist1_sq = jnp.minimum(dist1_sq, dsq[k])

    mask = jnp.where(dist1_sq < r_p2, valid, 0.0)                    # (8, tl)

    # topk(k=1, largest=False): first-occurrence argmin, handled row by row.
    # Row k is the argmin iff it attains the min and no earlier row did (ties -> first).
    not_seen = None
    gathered = None
    ml = []
    for k in range(K):
        attains = dsq[k] <= dist1_sq
        if not_seen is None:
            is_min_k = attains
            not_seen = jnp.logical_not(attains)
        else:
            is_min_k = jnp.logical_and(attains, not_seen)
            not_seen = jnp.logical_and(not_seen, jnp.logical_not(attains))
        ignore_k = jnp.logical_and(dsq[k] < r_n2, jnp.logical_not(is_min_k))
        ml_k = jnp.where(ignore_k, logits[k] - 10000.0, logits[k])
        ml.append(ml_k)
        contrib = jnp.where(is_min_k, ml_k, 0.0)
        gathered = contrib if gathered is None else gathered + contrib

    # logsumexp over K of the penalized logits.
    m = ml[0]
    for k in range(1, K):
        m = jnp.maximum(m, ml[k])
    se = jnp.exp(ml[0] - m)
    for k in range(1, K):
        se = se + jnp.exp(ml[k] - m)
    lse = m + jnp.log(se)
    loss_feat_per = lse - gathered                                   # (8, tl)

    # Distance to the correspondence (a single (8, tl) sqrt on the EUP).
    dcx = stx - cx
    dcy = sty - cy
    dcz = stz - cz
    dist_c_sq = dcx * dcx + dcy * dcy + dcz * dcz
    dist_c = jnp.sqrt(dist_c_sq)

    # Weighted BCE (reduction='mean' over the original N, divide done outside).
    label = dist_c_sq < r_p2
    weight = jnp.where(jnp.logical_xor(label, dist_c_sq < r_n2), 0.0, valid)
    label_f = label.astype(f32)
    log_s = jnp.maximum(jnp.log(score), -100.0)
    log_1ms = jnp.maximum(jnp.log(1.0 - score), -100.0)
    bce = -weight * (label_f * log_s + (1.0 - label_f) * log_1ms)    # (8, tl)

    # Lane-dense per-step partial sums (sublane reduce only); the cross-tile
    # reduction, cnt>0 guard and divides happen in plain JAX outside the kernel.
    part_ref[0:1, :] = jnp.sum(mask, axis=0, keepdims=True)
    part_ref[1:2, :] = jnp.sum(loss_feat_per * mask, axis=0, keepdims=True)
    part_ref[2:3, :] = jnp.sum(dist_c * mask, axis=0, keepdims=True)
    part_ref[3:4, :] = jnp.sum(bce, axis=0, keepdims=True)


def keypoint_matching_loss_packed(pts_packed, knn_packed, logits_packed, transform,
                                  num_points, positive_threshold, negative_threshold,
                                  *, block_lanes=1024):
    """Relayout-free entry point (preferred: produce this layout upstream).

    pts_packed    : (8, 8, L) f32   rows 0-2 tgt corres, 3-5 src xyz, 6 match_score, 7 unused
    knn_packed    : (3, K, 8, L)    f32 or bf16, coord-major grouped target points
    logits_packed : (K, 8, L)       f32 or bf16, match logits
    transform     : (16,) f32       flattened row-major 4x4 rigid transform
    num_points    : python int      original N; packed points with index >= N are padding
    Point p lives at (sublane = p // L, lane = p % L); for a multi-step grid, L must be
    a multiple of block_lanes (multiple of 128).
    """
    K = logits_packed.shape[0]
    L = logits_packed.shape[2]
    block_lanes = max(128, (int(block_lanes) // 128) * 128)
    tl = L if L <= block_lanes else block_lanes
    if L % tl != 0:
        raise ValueError("lane extent L must be a multiple of block_lanes for multi-step grids")
    grid = (L // tl,)

    kernel = functools.partial(
        _kpm_loss_kernel,
        float(positive_threshold) ** 2,
        float(negative_threshold) ** 2,
        int(L),
        int(num_points))

    grid_spec = pltpu.PrefetchScalarGridSpec(
        num_scalar_prefetch=0,
        grid=grid,
        in_specs=[
            pl.BlockSpec((8, 8, tl), lambda i: (0, 0, i)),
            pl.BlockSpec((3, K, 8, tl), lambda i: (0, 0, 0, i)),
            pl.BlockSpec((K, 8, tl), lambda i: (0, 0, i)),
            pl.BlockSpec(memory_space=pltpu.MemorySpace.SMEM),
        ],
        out_specs=pl.BlockSpec((4, tl), lambda i: (0, i)),
    )

    n_pts_pad = 8 * L
    cost = pl.CostEstimate(
        flops=int(n_pts_pad * (22 * K + 60)),
        transcendentals=int(n_pts_pad * (K + 4)),
        bytes_accessed=int(knn_packed.size * knn_packed.dtype.itemsize
                           + logits_packed.size * logits_packed.dtype.itemsize
                           + pts_packed.size * 4 + 4 * L * 4 + 16 * 4),
    )

    parts = pl.pallas_call(
        kernel,
        out_shape=jax.ShapeDtypeStruct((4, L), jnp.float32),
        grid_spec=grid_spec,
        compiler_params=pltpu.CompilerParams(
            # Independent tiles, no carried state -> megacore sharding on v7x.
            dimension_semantics=("parallel",)),
        cost_estimate=cost,
    )(pts_packed, knn_packed, logits_packed, transform)

    # Tiny finalize in plain JAX: cross-tile sum, cnt>0 guard (torch NaN->0), divides.
    sums = jnp.sum(parts, axis=1)                       # (4,)
    cnt = sums[0]
    inv_cnt = jnp.where(cnt > 0.0, 1.0 / cnt, 0.0)
    loss_feat = sums[1] * inv_cnt
    loss_corr = sums[2] * inv_cnt
    loss_ov = sums[3] / float(num_points)
    return loss_feat, loss_ov, loss_corr


def keypoint_matching_loss(corres, ref_knn_points, match_logits, corr_confidence,
                           gt_transform, positive_threshold, negative_threshold,
                           *, block_points=8192, bf16_inputs=False):
    """Torch-layout convenience wrapper.

    Performs the relayout (transpose / pad / reshape) into the sublane-packed,
    coord-major layout.  NOTE (perf review): these standalone XLA transposes roughly
    double end-to-end HBM traffic for this byte-bound kernel -- producers that can
    emit the packed layout directly should call keypoint_matching_loss_packed.
    """
    N, K = match_logits.shape
    block_lanes = max(128, (int(block_points) // 8 // 128) * 128)
    lanes_needed = -(-N // 8)
    if lanes_needed <= block_lanes:
        L = lanes_needed                    # single grid step: block == full arrays,
    else:                                   # no 128-lane padding, no per-step overhead
        L = -(-lanes_needed // block_lanes) * block_lanes
    n_pad = 8 * L
    pad = n_pad - N

    # bf16 storage for the two dominant inputs (HBM-bound v5e/v6e); math stays f32.
    in_dtype = jnp.bfloat16 if bf16_inputs else jnp.float32

    corres_f = corres.astype(jnp.float32)                                   # (N, 6)
    score_f = corr_confidence.astype(jnp.float32).reshape(N, 1)             # (N, 1)
    pts = jnp.concatenate(
        [corres_f, score_f, jnp.zeros((N, 1), jnp.float32)], axis=1)        # (N, 8)
    pts_packed = jnp.pad(pts.T, ((0, 0), (0, pad))).reshape(8, 8, L)

    knn_packed = jnp.pad(
        jnp.transpose(ref_knn_points.astype(in_dtype), (2, 1, 0)),
        ((0, 0), (0, 0), (0, pad))).reshape(3, K, 8, L)                     # (3, K, 8, L)
    logits_packed = jnp.pad(
        match_logits.astype(in_dtype).T, ((0, 0), (0, pad))).reshape(K, 8, L)
    transform = gt_transform.astype(jnp.float32).reshape(-1)                # (16,)

    return keypoint_matching_loss_packed(
        pts_packed, knn_packed, logits_packed, transform, N,
        positive_threshold, negative_threshold, block_lanes=block_lanes)


def reference_loss(corres, knn, logits, score, T, r_p, r_n):
    """Plain-JAX mirror of the torch module (for sanity checking)."""
    N = corres.shape[0]
    src = corres[:, 3:]
    tgt_corres = corres[:, :3]
    src_t = src @ T[:3, :3].T + T[:3, 3]
    dist = jnp.linalg.norm(src_t[:, None, :] - knn, axis=-1)
    idx1 = jnp.argmin(dist, axis=-1)
    dist1 = jnp.min(dist, axis=-1)
    mask = dist1 < r_p
    ignore = (dist < r_n).at[jnp.arange(N), idx1].set(False)
    ml = logits - 10000.0 * ignore.astype(jnp.float32)
    lse = jax.scipy.special.logsumexp(ml, axis=-1)
    gathered = ml[jnp.arange(N), idx1]
    lf = lse - gathered
    cnt = mask.sum()
    loss_feat = jnp.where(cnt > 0, (lf * mask).sum() / cnt, 0.0)
    dc = jnp.linalg.norm(src_t - tgt_corres, axis=-1)
    loss_corr = jnp.where(cnt > 0, (dc * mask).sum() / cnt, 0.0)
    label = (dc < r_p).astype(jnp.float32)
    weight = jnp.logical_not(jnp.logical_xor(dc < r_p, dc < r_n)).astype(jnp.float32)
    bce = -weight * (label * jnp.maximum(jnp.log(score), -100.0)
                     + (1.0 - label) * jnp.maximum(jnp.log(1.0 - score), -100.0))
    loss_ov = bce.mean()
    return loss_feat, loss_ov, loss_corr


if __name__ == "__main__":
    def make_inputs(key, N, K):
        k1, k2, k3, k4, k5 = jax.random.split(key, 5)
        ang = 0.1
        R = jnp.array([[jnp.cos(ang), -jnp.sin(ang), 0.0],
                       [jnp.sin(ang),  jnp.cos(ang), 0.0],
                       [0.0,           0.0,          1.0]], dtype=jnp.float32)
        t = jnp.array([0.2, -0.1, 0.05], dtype=jnp.float32)
        gt_transform = jnp.eye(4, dtype=jnp.float32).at[:3, :3].set(R).at[:3, 3].set(t)
        src_xyz = jax.random.uniform(k1, (N, 3), dtype=jnp.float32)
        src_w = src_xyz @ R.T + t
        ref_knn_points = src_w[:, None, :] + 0.4 * jax.random.normal(
            k2, (N, K, 3), dtype=jnp.float32)
        tgt_corres = src_w + 0.2 * jax.random.normal(k3, (N, 3), dtype=jnp.float32)
        corres = jnp.concatenate([tgt_corres, src_xyz], axis=1)             # (N, 6)
        match_logits = jax.random.normal(k4, (N, K), dtype=jnp.float32)
        corr_confidence = jax.nn.sigmoid(jax.random.normal(k5, (N,), dtype=jnp.float32))
        return corres, ref_knn_points, match_logits, corr_confidence, gt_transform

    r_p, r_n = 0.5, 1.0
    key = jax.random.PRNGKey(0)
    k_small, k_big = jax.random.split(key)

    # Case 1: small N not a multiple of 8 -> exercises the padding / validity mask on
    # the single-grid-step fast path (block == full arrays, no 128-lane padding).
    args1 = make_inputs(k_small, 203, 16)
    out1 = jax.block_until_ready(keypoint_matching_loss(*args1, r_p, r_n))
    ref1 = reference_loss(args1[0], args1[1], args1[2], args1[3], args1[4], r_p, r_n)
    for got, exp in zip(out1, ref1):
        assert jnp.allclose(got, exp, atol=1e-3, rtol=1e-3), (got, exp)

    # Case 2: forced multi-tile grid (block_points=1024 -> 128-lane tiles) to exercise
    # the lane padding, the validity mask and the "parallel" tile axis.
    args2 = make_inputs(k_big, 1100, 8)
    out2 = jax.block_until_ready(
        keypoint_matching_loss(*args2, r_p, r_n, block_points=1024))
    ref2 = reference_loss(args2[0], args2[1], args2[2], args2[3], args2[4], r_p, r_n)
    for got, exp in zip(out2, ref2):
        assert jnp.allclose(got, exp, atol=1e-3, rtol=1e-3), (got, exp)

    print("KERNEL_OK")
</pallas_src>

<mosaic_0001>
module attributes {stable_mosaic.version = 11 : i64} {
  func.func @_kpm_loss_kernel(%arg0: i32, %arg1: memref<8x8x26xf32, #tpu.memory_space<vmem>>, %arg2: memref<3x16x8x26xf32, #tpu.memory_space<vmem>>, %arg3: memref<16x8x26xf32, #tpu.memory_space<vmem>>, %arg4: memref<16xf32, #tpu.memory_space<smem>>, %arg5: memref<4x26xf32, #tpu.memory_space<vmem>>) attributes {dimension_semantics = [#tpu.dimension_semantics<parallel>], iteration_bounds = array<i64: 1>, scalar_prefetch = 0 : i64, scratch_operands = 0 : i64, tpu.core_type = #tpu.core_type<tc>, window_params = [{transform_indices = @transform_0, window_bounds = array<i64: 8, 8, 26>}, {transform_indices = @transform_1, window_bounds = array<i64: 3, 16, 8, 26>}, {transform_indices = @transform_2, window_bounds = array<i64: 16, 8, 26>}, {transform_indices = @transform_3, window_bounds = array<i64: 16>}, {transform_indices = @transform_4, window_bounds = array<i64: 4, 26>}]} {
    %c0 = arith.constant 0 : index
    %0 = memref.load %arg4[%c0] : memref<16xf32, #tpu.memory_space<smem>>
    %c1 = arith.constant 1 : index
    %1 = memref.load %arg4[%c1] : memref<16xf32, #tpu.memory_space<smem>>
    %c2 = arith.constant 2 : index
    %2 = memref.load %arg4[%c2] : memref<16xf32, #tpu.memory_space<smem>>
    %c3 = arith.constant 3 : index
    %3 = memref.load %arg4[%c3] : memref<16xf32, #tpu.memory_space<smem>>
    %c4 = arith.constant 4 : index
    %4 = memref.load %arg4[%c4] : memref<16xf32, #tpu.memory_space<smem>>
    %c5 = arith.constant 5 : index
    %5 = memref.load %arg4[%c5] : memref<16xf32, #tpu.memory_space<smem>>
    %c6 = arith.constant 6 : index
    %6 = memref.load %arg4[%c6] : memref<16xf32, #tpu.memory_space<smem>>
    %c7 = arith.constant 7 : index
    %7 = memref.load %arg4[%c7] : memref<16xf32, #tpu.memory_space<smem>>
    %c8 = arith.constant 8 : index
    %8 = memref.load %arg4[%c8] : memref<16xf32, #tpu.memory_space<smem>>
    %c9 = arith.constant 9 : index
    %9 = memref.load %arg4[%c9] : memref<16xf32, #tpu.memory_space<smem>>
    %c10 = arith.constant 10 : index
    %10 = memref.load %arg4[%c10] : memref<16xf32, #tpu.memory_space<smem>>
    %c11 = arith.constant 11 : index
    %11 = memref.load %arg4[%c11] : memref<16xf32, #tpu.memory_space<smem>>
    %c0_0 = arith.constant 0 : index
    %c0_1 = arith.constant 0 : index
    %c0_2 = arith.constant 0 : index
    %12 = vector.load %arg1[%c0_0, %c0_1, %c0_2] : memref<8x8x26xf32, #tpu.memory_space<vmem>>, vector<1x8x26xf32>
    %13 = vector.shape_cast %12 : vector<1x8x26xf32> to vector<8x26xf32>
    %c1_3 = arith.constant 1 : index
    %c0_4 = arith.constant 0 : index
    %c0_5 = arith.constant 0 : index
    %14 = vector.load %arg1[%c1_3, %c0_4, %c0_5] : memref<8x8x26xf32, #tpu.memory_space<vmem>>, vector<1x8x26xf32>
    %15 = vector.shape_cast %14 : vector<1x8x26xf32> to vector<8x26xf32>
    %c2_6 = arith.constant 2 : index
    %c0_7 = arith.constant 0 : index
    %c0_8 = arith.constant 0 : index
    %16 = vector.load %arg1[%c2_6, %c0_7, %c0_8] : memref<8x8x26xf32, #tpu.memory_space<vmem>>, vector<1x8x26xf32>
    %17 = vector.shape_cast %16 : vector<1x8x26xf32> to vector<8x26xf32>
    %c3_9 = arith.constant 3 : index
    %c0_10 = arith.constant 0 : index
    %c0_11 = arith.constant 0 : index
    %18 = vector.load %arg1[%c3_9, %c0_10, %c0_11] : memref<8x8x26xf32, #tpu.memory_space<vmem>>, vector<1x8x26xf32>
    %19 = vector.shape_cast %18 : vector<1x8x26xf32> to vector<8x26xf32>
    %c4_12 = arith.constant 4 : index
    %c0_13 = arith.constant 0 : index
    %c0_14 = arith.constant 0 : index
    %20 = vector.load %arg1[%c4_12, %c0_13, %c0_14] : memref<8x8x26xf32, #tpu.memory_space<vmem>>, vector<1x8x26xf32>
    %21 = vector.shape_cast %20 : vector<1x8x26xf32> to vector<8x26xf32>
    %c5_15 = arith.constant 5 : index
    %c0_16 = arith.constant 0 : index
    %c0_17 = arith.constant 0 : index
    %22 = vector.load %arg1[%c5_15, %c0_16, %c0_17] : memref<8x8x26xf32, #tpu.memory_space<vmem>>, vector<1x8x26xf32>
    %23 = vector.shape_cast %22 : vector<1x8x26xf32> to vector<8x26xf32>
    %c6_18 = arith.constant 6 : index
    %c0_19 = arith.constant 0 : index
    %c0_20 = arith.constant 0 : index
    %24 = vector.load %arg1[%c6_18, %c0_19, %c0_20] : memref<8x8x26xf32, #tpu.memory_space<vmem>>, vector<1x8x26xf32>
    %25 = vector.shape_cast %24 : vector<1x8x26xf32> to vector<8x26xf32>
    %26 = vector.broadcast %0 : f32 to vector<8x26xf32>
    %27 = arith.mulf %19, %26 : vector<8x26xf32>
    %28 = vector.broadcast %1 : f32 to vector<8x26xf32>
    %29 = arith.mulf %21, %28 : vector<8x26xf32>
    %30 = arith.addf %27, %29 : vector<8x26xf32>
    %31 = vector.broadcast %2 : f32 to vector<8x26xf32>
    %32 = arith.mulf %23, %31 : vector<8x26xf32>
    %33 = arith.addf %30, %32 : vector<8x26xf32>
    %34 = vector.broadcast %3 : f32 to vector<8x26xf32>
    %35 = arith.addf %33, %34 : vector<8x26xf32>
    %36 = vector.broadcast %4 : f32 to vector<8x26xf32>
    %37 = arith.mulf %19, %36 : vector<8x26xf32>
    %38 = vector.broadcast %5 : f32 to vector<8x26xf32>
    %39 = arith.mulf %21, %38 : vector<8x26xf32>
    %40 = arith.addf %37, %39 : vector<8x26xf32>
    %41 = vector.broadcast %6 : f32 to vector<8x26xf32>
    %42 = arith.mulf %23, %41 : vector<8x26xf32>
    %43 = arith.addf %40, %42 : vector<8x26xf32>
    %44 = vector.broadcast %7 : f32 to vector<8x26xf32>
    %45 = arith.addf %43, %44 : vector<8x26xf32>
    %46 = vector.broadcast %8 : f32 to vector<8x26xf32>
    %47 = arith.mulf %19, %46 : vector<8x26xf32>
    %48 = vector.broadcast %9 : f32 to vector<8x26xf32>
    %49 = arith.mulf %21, %48 : vector<8x26xf32>
    %50 = arith.addf %47, %49 : vector<8x26xf32>
    %51 = vector.broadcast %10 : f32 to vector<8x26xf32>
    %52 = arith.mulf %23, %51 : vector<8x26xf32>
    %53 = arith.addf %50, %52 : vector<8x26xf32>
    %54 = vector.broadcast %11 : f32 to vector<8x26xf32>
    %55 = arith.addf %53, %54 : vector<8x26xf32>
    %56 = tpu.iota {dimensions = array<i32: 0>} : vector<8x26xi32>
    %57 = tpu.iota {dimensions = array<i32: 1>} : vector<8x26xi32>
    %c26_i32 = arith.constant 26 : i32
    %58 = vector.broadcast %c26_i32 : i32 to vector<8x26xi32>
    %59 = arith.muli %56, %58 : vector<8x26xi32>
    %c26_i32_21 = arith.constant 26 : i32
    %60 = arith.muli %arg0, %c26_i32_21 : i32
    %61 = vector.broadcast %60 : i32 to vector<8x26xi32>
    %62 = arith.addi %61, %57 : vector<8x26xi32>
    %63 = arith.addi %59, %62 : vector<8x26xi32>
    %c203_i32 = arith.constant 203 : i32
    %64 = vector.broadcast %c203_i32 : i32 to vector<8x26xi32>
    %65 = arith.cmpi slt, %63, %64 : vector<8x26xi32>
    %66 = arith.extui %65 : vector<8x26xi1> to vector<8x26xi32>
    %67 = arith.sitofp %66 : vector<8x26xi32> to vector<8x26xf32>
    %c0_22 = arith.constant 0 : index
    %c0_23 = arith.constant 0 : index
    %c0_24 = arith.constant 0 : index
    %c0_25 = arith.constant 0 : index
    %68 = vector.load %arg2[%c0_22, %c0_23, %c0_24, %c0_25] : memref<3x16x8x26xf32, #tpu.memory_space<vmem>>, vector<1x16x8x26xf32>
    %69 = vector.shape_cast %68 : vector<1x16x8x26xf32> to vector<16x8x26xf32>
    %c1_26 = arith.constant 1 : index
    %c0_27 = arith.constant 0 : index
    %c0_28 = arith.constant 0 : index
    %c0_29 = arith.constant 0 : index
    %70 = vector.load %arg2[%c1_26, %c0_27, %c0_28, %c0_29] : memref<3x16x8x26xf32, #tpu.memory_space<vmem>>, vector<1x16x8x26xf32>
    %71 = vector.shape_cast %70 : vector<1x16x8x26xf32> to vector<16x8x26xf32>
    %c2_30 = arith.constant 2 : index
    %c0_31 = arith.constant 0 : index
    %c0_32 = arith.constant 0 : index
    %c0_33 = arith.constant 0 : index
    %72 = vector.load %arg2[%c2_30, %c0_31, %c0_32, %c0_33] : memref<3x16x8x26xf32, #tpu.memory_space<vmem>>, vector<1x16x8x26xf32>
    %73 = vector.shape_cast %72 : vector<1x16x8x26xf32> to vector<16x8x26xf32>
    %c0_34 = arith.constant 0 : index
    %c0_35 = arith.constant 0 : index
    %c0_36 = arith.constant 0 : index
    %74 = vector.load %arg3[%c0_34, %c0_35, %c0_36] : memref<16x8x26xf32, #tpu.memory_space<vmem>>, vector<16x8x26xf32>
    %75 = vector.extract_strided_slice %69 {offsets = [0, 0, 0], sizes = [1, 8, 26], strides = [1, 1, 1]} : vector<16x8x26xf32> to vector<1x8x26xf32>
    %76 = vector.shape_cast %75 : vector<1x8x26xf32> to vector<8x26xf32>
    %77 = arith.subf %35, %76 : vector<8x26xf32>
    %78 = vector.extract_strided_slice %71 {offsets = [0, 0, 0], sizes = [1, 8, 26], strides = [1, 1, 1]} : vector<16x8x26xf32> to vector<1x8x26xf32>
    %79 = vector.shape_cast %78 : vector<1x8x26xf32> to vector<8x26xf32>
    %80 = arith.subf %45, %79 : vector<8x26xf32>
    %81 = vector.extract_strided_slice %73 {offsets = [0, 0, 0], sizes = [1, 8, 26], strides = [1, 1, 1]} : vector<16x8x26xf32> to vector<1x8x26xf32>
    %82 = vector.shape_cast %81 : vector<1x8x26xf32> to vector<8x26xf32>
    %83 = arith.subf %55, %82 : vector<8x26xf32>
    %84 = arith.mulf %77, %77 : vector<8x26xf32>
    %85 = arith.mulf %80, %80 : vector<8x26xf32>
    %86 = arith.addf %84, %85 : vector<8x26xf32>
    %87 = arith.mulf %83, %83 : vector<8x26xf32>
    %88 = arith.addf %86, %87 : vector<8x26xf32>
    %89 = vector.extract_strided_slice %69 {offsets = [1, 0, 0], sizes = [1, 8, 26], strides = [1, 1, 1]} : vector<16x8x26xf32> to vector<1x8x26xf32>
    %90 = vector.shape_cast %89 : vector<1x8x26xf32> to vector<8x26xf32>
    %91 = arith.subf %35, %90 : vector<8x26xf32>
    %92 = vector.extract_strided_slice %71 {offsets = [1, 0, 0], sizes = [1, 8, 26], strides = [1, 1, 1]} : vector<16x8x26xf32> to vector<1x8x26xf32>
    %93 = vector.shape_cast %92 : vector<1x8x26xf32> to vector<8x26xf32>
    %94 = arith.subf %45, %93 : vector<8x26xf32>
    %95 = vector.extract_strided_slice %73 {offsets = [1, 0, 0], sizes = [1, 8, 26], strides = [1, 1, 1]} : vector<16x8x26xf32> to vector<1x8x26xf32>
    %96 = vector.shape_cast %95 : vector<1x8x26xf32> to vector<8x26xf32>
    %97 = arith.subf %55, %96 : vector<8x26xf32>
    %98 = arith.mulf %91, %91 : vector<8x26xf32>
    %99 = arith.mulf %94, %94 : vector<8x26xf32>
    %100 = arith.addf %98, %99 : vector<8x26xf32>
    %101 = arith.mulf %97, %97 : vector<8x26xf32>
    %102 = arith.addf %100, %101 : vector<8x26xf32>
    %103 = vector.extract_strided_slice %69 {offsets = [2, 0, 0], sizes = [1, 8, 26], strides = [1, 1, 1]} : vector<16x8x26xf32> to vector<1x8x26xf32>
    %104 = vector.shape_cast %103 : vector<1x8x26xf32> to vector<8x26xf32>
    %105 = arith.subf %35, %104 : vector<8x26xf32>
    %106 = vector.extract_strided_slice %71 {offsets = [2, 0, 0], sizes = [1, 8, 26], strides = [1, 1, 1]} : vector<16x8x26xf32> to vector<1x8x26xf32>
    %107 = vector.shape_cast %106 : vector<1x8x26xf32> to vector<8x26xf32>
    %108 = arith.subf %45, %107 : vector<8x26xf32>
    %109 = vector.extract_strided_slice %73 {offsets = [2, 0, 0], sizes = [1, 8, 26], strides = [1, 1, 1]} : vector<16x8x26xf32> to vector<1x8x26xf32>
    %110 = vector.shape_cast %109 : vector<1x8x26xf32> to vector<8x26xf32>
    %111 = arith.subf %55, %110 : vector<8x26xf32>
    %112 = arith.mulf %105, %105 : vector<8x26xf32>
    %113 = arith.mulf %108, %108 : vector<8x26xf32>
    %114 = arith.addf %112, %113 : vector<8x26xf32>
    %115 = arith.mulf %111, %111 : vector<8x26xf32>
    %116 = arith.addf %114, %115 : vector<8x26xf32>
    %117 = vector.extract_strided_slice %69 {offsets = [3, 0, 0], sizes = [1, 8, 26], strides = [1, 1, 1]} : vector<16x8x26xf32> to vector<1x8x26xf32>
    %118 = vector.shape_cast %117 : vector<1x8x26xf32> to vector<8x26xf32>
    %119 = arith.subf %35, %118 : vector<8x26xf32>
    %120 = vector.extract_strided_slice %71 {offsets = [3, 0, 0], sizes = [1, 8, 26], strides = [1, 1, 1]} : vector<16x8x26xf32> to vector<1x8x26xf32>
    %121 = vector.shape_cast %120 : vector<1x8x26xf32> to vector<8x26xf32>
    %122 = arith.subf %45, %121 : vector<8x26xf32>
    %123 = vector.extract_strided_slice %73 {offsets = [3, 0, 0], sizes = [1, 8, 26], strides = [1, 1, 1]} : vector<16x8x26xf32> to vector<1x8x26xf32>
    %124 = vector.shape_cast %123 : vector<1x8x26xf32> to vector<8x26xf32>
    %125 = arith.subf %55, %124 : vector<8x26xf32>
    %126 = arith.mulf %119, %119 : vector<8x26xf32>
    %127 = arith.mulf %122, %122 : vector<8x26xf32>
    %128 = arith.addf %126, %127 : vector<8x26xf32>
    %129 = arith.mulf %125, %125 : vector<8x26xf32>
    %130 = arith.addf %128, %129 : vector<8x26xf32>
    %131 = vector.extract_strided_slice %69 {offsets = [4, 0, 0], sizes = [1, 8, 26], strides = [1, 1, 1]} : vector<16x8x26xf32> to vector<1x8x26xf32>
    %132 = vector.shape_cast %131 : vector<1x8x26xf32> to vector<8x26xf32>
    %133 = arith.subf %35, %132 : vector<8x26xf32>
    %134 = vector.extract_strided_slice %71 {offsets = [4, 0, 0], sizes = [1, 8, 26], strides = [1, 1, 1]} : vector<16x8x26xf32> to vector<1x8x26xf32>
    %135 = vector.shape_cast %134 : vector<1x8x26xf32> to vector<8x26xf32>
    %136 = arith.subf %45, %135 : vector<8x26xf32>
    %137 = vector.extract_strided_slice %73 {offsets = [4, 0, 0], sizes = [1, 8, 26], strides = [1, 1, 1]} : vector<16x8x26xf32> to vector<1x8x26xf32>
    %138 = vector.shape_cast %137 : vector<1x8x26xf32> to vector<8x26xf32>
    %139 = arith.subf %55, %138 : vector<8x26xf32>
    %140 = arith.mulf %133, %133 : vector<8x26xf32>
    %141 = arith.mulf %136, %136 : vector<8x26xf32>
    %142 = arith.addf %140, %141 : vector<8x26xf32>
    %143 = arith.mulf %139, %139 : vector<8x26xf32>
    %144 = arith.addf %142, %143 : vector<8x26xf32>
    %145 = vector.extract_strided_slice %69 {offsets = [5, 0, 0], sizes = [1, 8, 26], strides = [1, 1, 1]} : vector<16x8x26xf32> to vector<1x8x26xf32>
    %146 = vector.shape_cast %145 : vector<1x8x26xf32> to vector<8x26xf32>
    %147 = arith.subf %35, %146 : vector<8x26xf32>
    %148 = vector.extract_strided_slice %71 {offsets = [5, 0, 0], sizes = [1, 8, 26], strides = [1, 1, 1]} : vector<16x8x26xf32> to vector<1x8x26xf32>
    %149 = vector.shape_cast %148 : vector<1x8x26xf32> to vector<8x26xf32>
    %150 = arith.subf %45, %149 : vector<8x26xf32>
    %151 = vector.extract_strided_slice %73 {offsets = [5, 0, 0], sizes = [1, 8, 26], strides = [1, 1, 1]} : vector<16x8x26xf32> to vector<1x8x26xf32>
    %152 = vector.shape_cast %151 : vector<1x8x26xf32> to vector<8x26xf32>
    %153 = arith.subf %55, %152 : vector<8x26xf32>
    %154 = arith.mulf %147, %147 : vector<8x26xf32>
    %155 = arith.mulf %150, %150 : vector<8x26xf32>
    %156 = arith.addf %154, %155 : vector<8x26xf32>
    %157 = arith.mulf %153, %153 : vector<8x26xf32>
    %158 = arith.addf %156, %157 : vector<8x26xf32>
    %159 = vector.extract_strided_slice %69 {offsets = [6, 0, 0], sizes = [1, 8, 26], strides = [1, 1, 1]} : vector<16x8x26xf32> to vector<1x8x26xf32>
    %160 = vector.shape_cast %159 : vector<1x8x26xf32> to vector<8x26xf32>
    %161 = arith.subf %35, %160 : vector<8x26xf32>
    %162 = vector.extract_strided_slice %71 {offsets = [6, 0, 0], sizes = [1, 8, 26], strides = [1, 1, 1]} : vector<16x8x26xf32> to vector<1x8x26xf32>
    %163 = vector.shape_cast %162 : vector<1x8x26xf32> to vector<8x26xf32>
    %164 = arith.subf %45, %163 : vector<8x26xf32>
    %165 = vector.extract_strided_slice %73 {offsets = [6, 0, 0], sizes = [1, 8, 26], strides = [1, 1, 1]} : vector<16x8x26xf32> to vector<1x8x26xf32>
    %166 = vector.shape_cast %165 : vector<1x8x26xf32> to vector<8x26xf32>
    %167 = arith.subf %55, %166 : vector<8x26xf32>
    %168 = arith.mulf %161, %161 : vector<8x26xf32>
    %169 = arith.mulf %164, %164 : vector<8x26xf32>
    %170 = arith.addf %168, %169 : vector<8x26xf32>
    %171 = arith.mulf %167, %167 : vector<8x26xf32>
    %172 = arith.addf %170, %171 : vector<8x26xf32>
    %173 = vector.extract_strided_slice %69 {offsets = [7, 0, 0], sizes = [1, 8, 26], strides = [1, 1, 1]} : vector<16x8x26xf32> to vector<1x8x26xf32>
    %174 = vector.shape_cast %173 : vector<1x8x26xf32> to vector<8x26xf32>
    %175 = arith.subf %35, %174 : vector<8x26xf32>
    %176 = vector.extract_strided_slice %71 {offsets = [7, 0, 0], sizes = [1, 8, 26], strides = [1, 1, 1]} : vector<16x8x26xf32> to vector<1x8x26xf32>
    %177 = vector.shape_cast %176 : vector<1x8x26xf32> to vector<8x26xf32>
    %178 = arith.subf %45, %177 : vector<8x26xf32>
    %179 = vector.extract_strided_slice %73 {offsets = [7, 0, 0], sizes = [1, 8, 26], strides = [1, 1, 1]} : vector<16x8x26xf32> to vector<1x8x26xf32>
    %180 = vector.shape_cast %179 : vector<1x8x26xf32> to vector<8x26xf32>
    %181 = arith.subf %55, %180 : vector<8x26xf32>
    %182 = arith.mulf %175, %175 : vector<8x26xf32>
    %183 = arith.mulf %178, %178 : vector<8x26xf32>
    %184 = arith.addf %182, %183 : vector<8x26xf32>
    %185 = arith.mulf %181, %181 : vector<8x26xf32>
    %186 = arith.addf %184, %185 : vector<8x26xf32>
    %187 = vector.extract_strided_slice %69 {offsets = [8, 0, 0], sizes = [1, 8, 26], strides = [1, 1, 1]} : vector<16x8x26xf32> to vector<1x8x26xf32>
    %188 = vector.shape_cast %187 : vector<1x8x26xf32> to vector<8x26xf32>
    %189 = arith.subf %35, %188 : vector<8x26xf32>
    %190 = vector.extract_strided_slice %71 {offsets = [8, 0, 0], sizes = [1, 8, 26], strides = [1, 1, 1]} : vector<16x8x26xf32> to vector<1x8x26xf32>
    %191 = vector.shape_cast %190 : vector<1x8x26xf32> to vector<8x26xf32>
    %192 = arith.subf %45, %191 : vector<8x26xf32>
    %193 = vector.extract_strided_slice %73 {offsets = [8, 0, 0], sizes = [1, 8, 26], strides = [1, 1, 1]} : vector<16x8x26xf32> to vector<1x8x26xf32>
    %194 = vector.shape_cast %193 : vector<1x8x26xf32> to vector<8x26xf32>
    %195 = arith.subf %55, %194 : vector<8x26xf32>
    %196 = arith.mulf %189, %189 : vector<8x26xf32>
    %197 = arith.mulf %192, %192 : vector<8x26xf32>
    %198 = arith.addf %196, %197 : vector<8x26xf32>
    %199 = arith.mulf %195, %195 : vector<8x26xf32>
    %200 = arith.addf %198, %199 : vector<8x26xf32>
    %201 = vector.extract_strided_slice %69 {offsets = [9, 0, 0], sizes = [1, 8, 26], strides = [1, 1, 1]} : vector<16x8x26xf32> to vector<1x8x26xf32>
    %202 = vector.shape_cast %201 : vector<1x8x26xf32> to vector<8x26xf32>
    %203 = arith.subf %35, %202 : vector<8x26xf32>
    %204 = vector.extract_strided_slice %71 {offsets = [9, 0, 0], sizes = [1, 8, 26], strides = [1, 1, 1]} : vector<16x8x26xf32> to vector<1x8x26xf32>
    %205 = vector.shape_cast %204 : vector<1x8x26xf32> to vector<8x26xf32>
    %206 = arith.subf %45, %205 : vector<8x26xf32>
    %207 = vector.extract_strided_slice %73 {offsets = [9, 0, 0], sizes = [1, 8, 26], strides = [1, 1, 1]} : vector<16x8x26xf32> to vector<1x8x26xf32>
    %208 = vector.shape_cast %207 : vector<1x8x26xf32> to vector<8x26xf32>
    %209 = arith.subf %55, %208 : vector<8x26xf32>
    %210 = arith.mulf %203, %203 : vector<8x26xf32>
    %211 = arith.mulf %206, %206 : vector<8x26xf32>
    %212 = arith.addf %210, %211 : vector<8x26xf32>
    %213 = arith.mulf %209, %209 : vector<8x26xf32>
    %214 = arith.addf %212, %213 : vector<8x26xf32>
    %215 = vector.extract_strided_slice %69 {offsets = [10, 0, 0], sizes = [1, 8, 26], strides = [1, 1, 1]} : vector<16x8x26xf32> to vector<1x8x26xf32>
    %216 = vector.shape_cast %215 : vector<1x8x26xf32> to vector<8x26xf32>
    %217 = arith.subf %35, %216 : vector<8x26xf32>
    %218 = vector.extract_strided_slice %71 {offsets = [10, 0, 0], sizes = [1, 8, 26], strides = [1, 1, 1]} : vector<16x8x26xf32> to vector<1x8x26xf32>
    %219 = vector.shape_cast %218 : vector<1x8x26xf32> to vector<8x26xf32>
    %220 = arith.subf %45, %219 : vector<8x26xf32>
    %221 = vector.extract_strided_slice %73 {offsets = [10, 0, 0], sizes = [1, 8, 26], strides = [1, 1, 1]} : vector<16x8x26xf32> to vector<1x8x26xf32>
    %222 = vector.shape_cast %221 : vector<1x8x26xf32> to vector<8x26xf32>
    %223 = arith.subf %55, %222 : vector<8x26xf32>
    %224 = arith.mulf %217, %217 : vector<8x26xf32>
    %225 = arith.mulf %220, %220 : vector<8x26xf32>
    %226 = arith.addf %224, %225 : vector<8x26xf32>
    %227 = arith.mulf %223, %223 : vector<8x26xf32>
    %228 = arith.addf %226, %227 : vector<8x26xf32>
    %229 = vector.extract_strided_slice %69 {offsets = [11, 0, 0], sizes = [1, 8, 26], strides = [1, 1, 1]} : vector<16x8x26xf32> to vector<1x8x26xf32>
    %230 = vector.shape_cast %229 : vector<1x8x26xf32> to vector<8x26xf32>
    %231 = arith.subf %35, %230 : vector<8x26xf32>
    %232 = vector.extract_strided_slice %71 {offsets = [11, 0, 0], sizes = [1, 8, 26], strides = [1, 1, 1]} : vector<16x8x26xf32> to vector<1x8x26xf32>
    %233 = vector.shape_cast %232 : vector<1x8x26xf32> to vector<8x26xf32>
    %234 = arith.subf %45, %233 : vector<8x26xf32>
    %235 = vector.extract_strided_slice %73 {offsets = [11, 0, 0], sizes = [1, 8, 26], strides = [1, 1, 1]} : vector<16x8x26xf32> to vector<1x8x26xf32>
    %236 = vector.shape_cast %235 : vector<1x8x26xf32> to vector<8x26xf32>
    %237 = arith.subf %55, %236 : vector<8x26xf32>
    %238 = arith.mulf %231, %231 : vector<8x26xf32>
    %239 = arith.mulf %234, %234 : vector<8x26xf32>
    %240 = arith.addf %238, %239 : vector<8x26xf32>
    %241 = arith.mulf %237, %237 : vector<8x26xf32>
    %242 = arith.addf %240, %241 : vector<8x26xf32>
    %243 = vector.extract_strided_slice %69 {offsets = [12, 0, 0], sizes = [1, 8, 26], strides = [1, 1, 1]} : vector<16x8x26xf32> to vector<1x8x26xf32>
    %244 = vector.shape_cast %243 : vector<1x8x26xf32> to vector<8x26xf32>
    %245 = arith.subf %35, %244 : vector<8x26xf32>
    %246 = vector.extract_strided_slice %71 {offsets = [12, 0, 0], sizes = [1, 8, 26], strides = [1, 1, 1]} : vector<16x8x26xf32> to vector<1x8x26xf32>
    %247 = vector.shape_cast %246 : vector<1x8x26xf32> to vector<8x26xf32>
    %248 = arith.subf %45, %247 : vector<8x26xf32>
    %249 = vector.extract_strided_slice %73 {offsets = [12, 0, 0], sizes = [1, 8, 26], strides = [1, 1, 1]} : vector<16x8x26xf32> to vector<1x8x26xf32>
    %250 = vector.shape_cast %249 : vector<1x8x26xf32> to vector<8x26xf32>
    %251 = arith.subf %55, %250 : vector<8x26xf32>
    %252 = arith.mulf %245, %245 : vector<8x26xf32>
    %253 = arith.mulf %248, %248 : vector<8x26xf32>
    %254 = arith.addf %252, %253 : vector<8x26xf32>
    %255 = arith.mulf %251, %251 : vector<8x26xf32>
    %256 = arith.addf %254, %255 : vector<8x26xf32>
    %257 = vector.extract_strided_slice %69 {offsets = [13, 0, 0], sizes = [1, 8, 26], strides = [1, 1, 1]} : vector<16x8x26xf32> to vector<1x8x26xf32>
    %258 = vector.shape_cast %257 : vector<1x8x26xf32> to vector<8x26xf32>
    %259 = arith.subf %35, %258 : vector<8x26xf32>
    %260 = vector.extract_strided_slice %71 {offsets = [13, 0, 0], sizes = [1, 8, 26], strides = [1, 1, 1]} : vector<16x8x26xf32> to vector<1x8x26xf32>
    %261 = vector.shape_cast %260 : vector<1x8x26xf32> to vector<8x26xf32>
    %262 = arith.subf %45, %261 : vector<8x26xf32>
    %263 = vector.extract_strided_slice %73 {offsets = [13, 0, 0], sizes = [1, 8, 26], strides = [1, 1, 1]} : vector<16x8x26xf32> to vector<1x8x26xf32>
    %264 = vector.shape_cast %263 : vector<1x8x26xf32> to vector<8x26xf32>
    %265 = arith.subf %55, %264 : vector<8x26xf32>
    %266 = arith.mulf %259, %259 : vector<8x26xf32>
    %267 = arith.mulf %262, %262 : vector<8x26xf32>
    %268 = arith.addf %266, %267 : vector<8x26xf32>
    %269 = arith.mulf %265, %265 : vector<8x26xf32>
    %270 = arith.addf %268, %269 : vector<8x26xf32>
    %271 = vector.extract_strided_slice %69 {offsets = [14, 0, 0], sizes = [1, 8, 26], strides = [1, 1, 1]} : vector<16x8x26xf32> to vector<1x8x26xf32>
    %272 = vector.shape_cast %271 : vector<1x8x26xf32> to vector<8x26xf32>
    %273 = arith.subf %35, %272 : vector<8x26xf32>
    %274 = vector.extract_strided_slice %71 {offsets = [14, 0, 0], sizes = [1, 8, 26], strides = [1, 1, 1]} : vector<16x8x26xf32> to vector<1x8x26xf32>
    %275 = vector.shape_cast %274 : vector<1x8x26xf32> to vector<8x26xf32>
    %276 = arith.subf %45, %275 : vector<8x26xf32>
    %277 = vector.extract_strided_slice %73 {offsets = [14, 0, 0], sizes = [1, 8, 26], strides = [1, 1, 1]} : vector<16x8x26xf32> to vector<1x8x26xf32>
    %278 = vector.shape_cast %277 : vector<1x8x26xf32> to vector<8x26xf32>
    %279 = arith.subf %55, %278 : vector<8x26xf32>
    %280 = arith.mulf %273, %273 : vector<8x26xf32>
    %281 = arith.mulf %276, %276 : vector<8x26xf32>
    %282 = arith.addf %280, %281 : vector<8x26xf32>
    %283 = arith.mulf %279, %279 : vector<8x26xf32>
    %284 = arith.addf %282, %283 : vector<8x26xf32>
    %285 = vector.extract_strided_slice %69 {offsets = [15, 0, 0], sizes = [1, 8, 26], strides = [1, 1, 1]} : vector<16x8x26xf32> to vector<1x8x26xf32>
    %286 = vector.shape_cast %285 : vector<1x8x26xf32> to vector<8x26xf32>
    %287 = arith.subf %35, %286 : vector<8x26xf32>
    %288 = vector.extract_strided_slice %71 {offsets = [15, 0, 0], sizes = [1, 8, 26], strides = [1, 1, 1]} : vector<16x8x26xf32> to vector<1x8x26xf32>
    %289 = vector.shape_cast %288 : vector<1x8x26xf32> to vector<8x26xf32>
    %290 = arith.subf %45, %289 : vector<8x26xf32>
    %291 = vector.extract_strided_slice %73 {offsets = [15, 0, 0], sizes = [1, 8, 26], strides = [1, 1, 1]} : vector<16x8x26xf32> to vector<1x8x26xf32>
    %292 = vector.shape_cast %291 : vector<1x8x26xf32> to vector<8x26xf32>
    %293 = arith.subf %55, %292 : vector<8x26xf32>
    %294 = arith.mulf %287, %287 : vector<8x26xf32>
    %295 = arith.mulf %290, %290 : vector<8x26xf32>
    %296 = arith.addf %294, %295 : vector<8x26xf32>
    %297 = arith.mulf %293, %293 : vector<8x26xf32>
    %298 = arith.addf %296, %297 : vector<8x26xf32>
    %299 = arith.minimumf %88, %102 : vector<8x26xf32>
    %300 = arith.minimumf %299, %116 : vector<8x26xf32>
    %301 = arith.minimumf %300, %130 : vector<8x26xf32>
    %302 = arith.minimumf %301, %144 : vector<8x26xf32>
    %303 = arith.minimumf %302, %158 : vector<8x26xf32>
    %304 = arith.minimumf %303, %172 : vector<8x26xf32>
    %305 = arith.minimumf %304, %186 : vector<8x26xf32>
    %306 = arith.minimumf %305, %200 : vector<8x26xf32>
    %307 = arith.minimumf %306, %214 : vector<8x26xf32>
    %308 = arith.minimumf %307, %228 : vector<8x26xf32>
    %309 = arith.minimumf %308, %242 : vector<8x26xf32>
    %310 = arith.minimumf %309, %256 : vector<8x26xf32>
    %311 = arith.minimumf %310, %270 : vector<8x26xf32>
    %312 = arith.minimumf %311, %284 : vector<8x26xf32>
    %313 = arith.minimumf %312, %298 : vector<8x26xf32>
    %cst = arith.constant 2.500000e-01 : f32
    %314 = vector.broadcast %cst : f32 to vector<8x26xf32>
    %315 = arith.cmpf olt, %313, %314 : vector<8x26xf32>
    %cst_37 = arith.constant 0.000000e+00 : f32
    %316 = vector.broadcast %cst_37 : f32 to vector<8x26xf32>
    %317 = arith.select %315, %67, %316 : vector<8x26xi1>, vector<8x26xf32>
    %318 = arith.cmpf ole, %88, %313 : vector<8x26xf32>
    %cst_38 = arith.constant dense<true> : vector<8x26xi1>
    %319 = arith.xori %318, %cst_38 : vector<8x26xi1>
    %cst_39 = arith.constant 1.000000e+00 : f32
    %320 = vector.broadcast %cst_39 : f32 to vector<8x26xf32>
    %321 = arith.cmpf olt, %88, %320 : vector<8x26xf32>
    %cst_40 = arith.constant dense<true> : vector<8x26xi1>
    %322 = arith.xori %318, %cst_40 : vector<8x26xi1>
    %323 = arith.andi %321, %322 : vector<8x26xi1>
    %324 = vector.extract_strided_slice %74 {offsets = [0, 0, 0], sizes = [1, 8, 26], strides = [1, 1, 1]} : vector<16x8x26xf32> to vector<1x8x26xf32>
    %325 = vector.shape_cast %324 : vector<1x8x26xf32> to vector<8x26xf32>
    %cst_41 = arith.constant 1.000000e+04 : f32
    %326 = vector.broadcast %cst_41 : f32 to vector<8x26xf32>
    %327 = arith.subf %325, %326 : vector<8x26xf32>
    %328 = vector.extract_strided_slice %74 {offsets = [0, 0, 0], sizes = [1, 8, 26], strides = [1, 1, 1]} : vector<16x8x26xf32> to vector<1x8x26xf32>
    %329 = vector.shape_cast %328 : vector<1x8x26xf32> to vector<8x26xf32>
    %330 = arith.select %323, %327, %329 : vector<8x26xi1>, vector<8x26xf32>
    %cst_42 = arith.constant 0.000000e+00 : f32
    %331 = vector.broadcast %cst_42 : f32 to vector<8x26xf32>
    %332 = arith.select %318, %330, %331 : vector<8x26xi1>, vector<8x26xf32>
    %333 = arith.cmpf ole, %102, %313 : vector<8x26xf32>
    %334 = arith.andi %333, %319 : vector<8x26xi1>
    %cst_43 = arith.constant dense<true> : vector<8x26xi1>
    %335 = arith.xori %333, %cst_43 : vector<8x26xi1>
    %336 = arith.andi %319, %335 : vector<8x26xi1>
    %cst_44 = arith.constant 1.000000e+00 : f32
    %337 = vector.broadcast %cst_44 : f32 to vector<8x26xf32>
    %338 = arith.cmpf olt, %102, %337 : vector<8x26xf32>
    %cst_45 = arith.constant dense<true> : vector<8x26xi1>
    %339 = arith.xori %334, %cst_45 : vector<8x26xi1>
    %340 = arith.andi %338, %339 : vector<8x26xi1>
    %341 = vector.extract_strided_slice %74 {offsets = [1, 0, 0], sizes = [1, 8, 26], strides = [1, 1, 1]} : vector<16x8x26xf32> to vector<1x8x26xf32>
    %342 = vector.shape_cast %341 : vector<1x8x26xf32> to vector<8x26xf32>
    %cst_46 = arith.constant 1.000000e+04 : f32
    %343 = vector.broadcast %cst_46 : f32 to vector<8x26xf32>
    %344 = arith.subf %342, %343 : vector<8x26xf32>
    %345 = vector.extract_strided_slice %74 {offsets = [1, 0, 0], sizes = [1, 8, 26], strides = [1, 1, 1]} : vector<16x8x26xf32> to vector<1x8x26xf32>
    %346 = vector.shape_cast %345 : vector<1x8x26xf32> to vector<8x26xf32>
    %347 = arith.select %340, %344, %346 : vector<8x26xi1>, vector<8x26xf32>
    %cst_47 = arith.constant 0.000000e+00 : f32
    %348 = vector.broadcast %cst_47 : f32 to vector<8x26xf32>
    %349 = arith.select %334, %347, %348 : vector<8x26xi1>, vector<8x26xf32>
    %350 = arith.addf %332, %349 : vector<8x26xf32>
    %351 = arith.cmpf ole, %116, %313 : vector<8x26xf32>
    %352 = arith.andi %351, %336 : vector<8x26xi1>
    %cst_48 = arith.constant dense<true> : vector<8x26xi1>
    %353 = arith.xori %351, %cst_48 : vector<8x26xi1>
    %354 = arith.andi %336, %353 : vector<8x26xi1>
    %cst_49 = arith.constant 1.000000e+00 : f32
    %355 = vector.broadcast %cst_49 : f32 to vector<8x26xf32>
    %356 = arith.cmpf olt, %116, %355 : vector<8x26xf32>
    %cst_50 = arith.constant dense<true> : vector<8x26xi1>
    %357 = arith.xori %352, %cst_50 : vector<8x26xi1>
    %358 = arith.andi %356, %357 : vector<8x26xi1>
    %359 = vector.extract_strided_slice %74 {offsets = [2, 0, 0], sizes = [1, 8, 26], strides = [1, 1, 1]} : vector<16x8x26xf32> to vector<1x8x26xf32>
    %360 = vector.shape_cast %359 : vector<1x8x26xf32> to vector<8x26xf32>
    %cst_51 = arith.constant 1.000000e+04 : f32
    %361 = vector.broadcast %cst_51 : f32 to vector<8x26xf32>
    %362 = arith.subf %360, %361 : vector<8x26xf32>
    %363 = vector.extract_strided_slice %74 {offsets = [2, 0, 0], sizes = [1, 8, 26], strides = [1, 1, 1]} : vector<16x8x26xf32> to vector<1x8x26xf32>
    %364 = vector.shape_cast %363 : vector<1x8x26xf32> to vector<8x26xf32>
    %365 = arith.select %358, %362, %364 : vector<8x26xi1>, vector<8x26xf32>
    %cst_52 = arith.constant 0.000000e+00 : f32
    %366 = vector.broadcast %cst_52 : f32 to vector<8x26xf32>
    %367 = arith.select %352, %365, %366 : vector<8x26xi1>, vector<8x26xf32>
    %368 = arith.addf %350, %367 : vector<8x26xf32>
    %369 = arith.cmpf ole, %130, %313 : vector<8x26xf32>
    %370 = arith.andi %369, %354 : vector<8x26xi1>
    %cst_53 = arith.constant dense<true> : vector<8x26xi1>
    %371 = arith.xori %369, %cst_53 : vector<8x26xi1>
    %372 = arith.andi %354, %371 : vector<8x26xi1>
    %cst_54 = arith.constant 1.000000e+00 : f32
    %373 = vector.broadcast %cst_54 : f32 to vector<8x26xf32>
    %374 = arith.cmpf olt, %130, %373 : vector<8x26xf32>
    %cst_55 = arith.constant dense<true> : vector<8x26xi1>
    %375 = arith.xori %370, %cst_55 : vector<8x26xi1>
    %376 = arith.andi %374, %375 : vector<8x26xi1>
    %377 = vector.extract_strided_slice %74 {offsets = [3, 0, 0], sizes = [1, 8, 26], strides = [1, 1, 1]} : vector<16x8x26xf32> to vector<1x8x26xf32>
    %378 = vector.shape_cast %377 : vector<1x8x26xf32> to vector<8x26xf32>
    %cst_56 = arith.constant 1.000000e+04 : f32
    %379 = vector.broadcast %cst_56 : f32 to vector<8x26xf32>
    %380 = arith.subf %378, %379 : vector<8x26xf32>
    %381 = vector.extract_strided_slice %74 {offsets = [3, 0, 0], sizes = [1, 8, 26], strides = [1, 1, 1]} : vector<16x8x26xf32> to vector<1x8x26xf32>
    %382 = vector.shape_cast %381 : vector<1x8x26xf32> to vector<8x26xf32>
    %383 = arith.select %376, %380, %382 : vector<8x26xi1>, vector<8x26xf32>
    %cst_57 = arith.constant 0.000000e+00 : f32
    %384 = vector.broadcast %cst_57 : f32 to vector<8x26xf32>
    %385 = arith.select %370, %383, %384 : vector<8x26xi1>, vector<8x26xf32>
    %386 = arith.addf %368, %385 : vector<8x26xf32>
    %387 = arith.cmpf ole, %144, %313 : vector<8x26xf32>
    %388 = arith.andi %387, %372 : vector<8x26xi1>
    %cst_58 = arith.constant dense<true> : vector<8x26xi1>
    %389 = arith.xori %387, %cst_58 : vector<8x26xi1>
    %390 = arith.andi %372, %389 : vector<8x26xi1>
    %cst_59 = arith.constant 1.000000e+00 : f32
    %391 = vector.broadcast %cst_59 : f32 to vector<8x26xf32>
    %392 = arith.cmpf olt, %144, %391 : vector<8x26xf32>
    %cst_60 = arith.constant dense<true> : vector<8x26xi1>
    %393 = arith.xori %388, %cst_60 : vector<8x26xi1>
    %394 = arith.andi %392, %393 : vector<8x26xi1>
    %395 = vector.extract_strided_slice %74 {offsets = [4, 0, 0], sizes = [1, 8, 26], strides = [1, 1, 1]} : vector<16x8x26xf32> to vector<1x8x26xf32>
    %396 = vector.shape_cast %395 : vector<1x8x26xf32> to vector<8x26xf32>
    %cst_61 = arith.constant 1.000000e+04 : f32
    %397 = vector.broadcast %cst_61 : f32 to vector<8x26xf32>
    %398 = arith.subf %396, %397 : vector<8x26xf32>
    %399 = vector.extract_strided_slice %74 {offsets = [4, 0, 0], sizes = [1, 8, 26], strides = [1, 1, 1]} : vector<16x8x26xf32> to vector<1x8x26xf32>
    %400 = vector.shape_cast %399 : vector<1x8x26xf32> to vector<8x26xf32>
    %401 = arith.select %394, %398, %400 : vector<8x26xi1>, vector<8x26xf32>
    %cst_62 = arith.constant 0.000000e+00 : f32
    %402 = vector.broadcast %cst_62 : f32 to vector<8x26xf32>
    %403 = arith.select %388, %401, %402 : vector<8x26xi1>, vector<8x26xf32>
    %404 = arith.addf %386, %403 : vector<8x26xf32>
    %405 = arith.cmpf ole, %158, %313 : vector<8x26xf32>
    %406 = arith.andi %405, %390 : vector<8x26xi1>
    %cst_63 = arith.constant dense<true> : vector<8x26xi1>
    %407 = arith.xori %405, %cst_63 : vector<8x26xi1>
    %408 = arith.andi %390, %407 : vector<8x26xi1>
    %cst_64 = arith.constant 1.000000e+00 : f32
    %409 = vector.broadcast %cst_64 : f32 to vector<8x26xf32>
    %410 = arith.cmpf olt, %158, %409 : vector<8x26xf32>
    %cst_65 = arith.constant dense<true> : vector<8x26xi1>
    %411 = arith.xori %406, %cst_65 : vector<8x26xi1>
    %412 = arith.andi %410, %411 : vector<8x26xi1>
    %413 = vector.extract_strided_slice %74 {offsets = [5, 0, 0], sizes = [1, 8, 26], strides = [1, 1, 1]} : vector<16x8x26xf32> to vector<1x8x26xf32>
    %414 = vector.shape_cast %413 : vector<1x8x26xf32> to vector<8x26xf32>
    %cst_66 = arith.constant 1.000000e+04 : f32
    %415 = vector.broadcast %cst_66 : f32 to vector<8x26xf32>
    %416 = arith.subf %414, %415 : vector<8x26xf32>
    %417 = vector.extract_strided_slice %74 {offsets = [5, 0, 0], sizes = [1, 8, 26], strides = [1, 1, 1]} : vector<16x8x26xf32> to vector<1x8x26xf32>
    %418 = vector.shape_cast %417 : vector<1x8x26xf32> to vector<8x26xf32>
    %419 = arith.select %412, %416, %418 : vector<8x26xi1>, vector<8x26xf32>
    %cst_67 = arith.constant 0.000000e+00 : f32
    %420 = vector.broadcast %cst_67 : f32 to vector<8x26xf32>
    %421 = arith.select %406, %419, %420 : vector<8x26xi1>, vector<8x26xf32>
    %422 = arith.addf %404, %421 : vector<8x26xf32>
    %423 = arith.cmpf ole, %172, %313 : vector<8x26xf32>
    %424 = arith.andi %423, %408 : vector<8x26xi1>
    %cst_68 = arith.constant dense<true> : vector<8x26xi1>
    %425 = arith.xori %423, %cst_68 : vector<8x26xi1>
    %426 = arith.andi %408, %425 : vector<8x26xi1>
    %cst_69 = arith.constant 1.000000e+00 : f32
    %427 = vector.broadcast %cst_69 : f32 to vector<8x26xf32>
    %428 = arith.cmpf olt, %172, %427 : vector<8x26xf32>
    %cst_70 = arith.constant dense<true> : vector<8x26xi1>
    %429 = arith.xori %424, %cst_70 : vector<8x26xi1>
    %430 = arith.andi %428, %429 : vector<8x26xi1>
    %431 = vector.extract_strided_slice %74 {offsets = [6, 0, 0], sizes = [1, 8, 26], strides = [1, 1, 1]} : vector<16x8x26xf32> to vector<1x8x26xf32>
    %432 = vector.shape_cast %431 : vector<1x8x26xf32> to vector<8x26xf32>
    %cst_71 = arith.constant 1.000000e+04 : f32
    %433 = vector.broadcast %cst_71 : f32 to vector<8x26xf32>
    %434 = arith.subf %432, %433 : vector<8x26xf32>
    %435 = vector.extract_strided_slice %74 {offsets = [6, 0, 0], sizes = [1, 8, 26], strides = [1, 1, 1]} : vector<16x8x26xf32> to vector<1x8x26xf32>
    %436 = vector.shape_cast %435 : vector<1x8x26xf32> to vector<8x26xf32>
    %437 = arith.select %430, %434, %436 : vector<8x26xi1>, vector<8x26xf32>
    %cst_72 = arith.constant 0.000000e+00 : f32
    %438 = vector.broadcast %cst_72 : f32 to vector<8x26xf32>
    %439 = arith.select %424, %437, %438 : vector<8x26xi1>, vector<8x26xf32>
    %440 = arith.addf %422, %439 : vector<8x26xf32>
    %441 = arith.cmpf ole, %186, %313 : vector<8x26xf32>
    %442 = arith.andi %441, %426 : vector<8x26xi1>
    %cst_73 = arith.constant dense<true> : vector<8x26xi1>
    %443 = arith.xori %441, %cst_73 : vector<8x26xi1>
    %444 = arith.andi %426, %443 : vector<8x26xi1>
    %cst_74 = arith.constant 1.000000e+00 : f32
    %445 = vector.broadcast %cst_74 : f32 to vector<8x26xf32>
    %446 = arith.cmpf olt, %186, %445 : vector<8x26xf32>
    %cst_75 = arith.constant dense<true> : vector<8x26xi1>
    %447 = arith.xori %442, %cst_75 : vector<8x26xi1>
    %448 = arith.andi %446, %447 : vector<8x26xi1>
    %449 = vector.extract_strided_slice %74 {offsets = [7, 0, 0], sizes = [1, 8, 26], strides = [1, 1, 1]} : vector<16x8x26xf32> to vector<1x8x26xf32>
    %450 = vector.shape_cast %449 : vector<1x8x26xf32> to vector<8x26xf32>
    %cst_76 = arith.constant 1.000000e+04 : f32
    %451 = vector.broadcast %cst_76 : f32 to vector<8x26xf32>
    %452 = arith.subf %450, %451 : vector<8x26xf32>
    %453 = vector.extract_strided_slice %74 {offsets = [7, 0, 0], sizes = [1, 8, 26], strides = [1, 1, 1]} : vector<16x8x26xf32> to vector<1x8x26xf32>
    %454 = vector.shape_cast %453 : vector<1x8x26xf32> to vector<8x26xf32>
    %455 = arith.select %448, %452, %454 : vector<8x26xi1>, vector<8x26xf32>
    %cst_77 = arith.constant 0.000000e+00 : f32
    %456 = vector.broadcast %cst_77 : f32 to vector<8x26xf32>
    %457 = arith.select %442, %455, %456 : vector<8x26xi1>, vector<8x26xf32>
    %458 = arith.addf %440, %457 : vector<8x26xf32>
    %459 = arith.cmpf ole, %200, %313 : vector<8x26xf32>
    %460 = arith.andi %459, %444 : vector<8x26xi1>
    %cst_78 = arith.constant dense<true> : vector<8x26xi1>
    %461 = arith.xori %459, %cst_78 : vector<8x26xi1>
    %462 = arith.andi %444, %461 : vector<8x26xi1>
    %cst_79 = arith.constant 1.000000e+00 : f32
    %463 = vector.broadcast %cst_79 : f32 to vector<8x26xf32>
    %464 = arith.cmpf olt, %200, %463 : vector<8x26xf32>
    %cst_80 = arith.constant dense<true> : vector<8x26xi1>
    %465 = arith.xori %460, %cst_80 : vector<8x26xi1>
    %466 = arith.andi %464, %465 : vector<8x26xi1>
    %467 = vector.extract_strided_slice %74 {offsets = [8, 0, 0], sizes = [1, 8, 26], strides = [1, 1, 1]} : vector<16x8x26xf32> to vector<1x8x26xf32>
    %468 = vector.shape_cast %467 : vector<1x8x26xf32> to vector<8x26xf32>
    %cst_81 = arith.constant 1.000000e+04 : f32
    %469 = vector.broadcast %cst_81 : f32 to vector<8x26xf32>
    %470 = arith.subf %468, %469 : vector<8x26xf32>
    %471 = vector.extract_strided_slice %74 {offsets = [8, 0, 0], sizes = [1, 8, 26], strides = [1, 1, 1]} : vector<16x8x26xf32> to vector<1x8x26xf32>
    %472 = vector.shape_cast %471 : vector<1x8x26xf32> to vector<8x26xf32>
    %473 = arith.select %466, %470, %472 : vector<8x26xi1>, vector<8x26xf32>
    %cst_82 = arith.constant 0.000000e+00 : f32
    %474 = vector.broadcast %cst_82 : f32 to vector<8x26xf32>
    %475 = arith.select %460, %473, %474 : vector<8x26xi1>, vector<8x26xf32>
    %476 = arith.addf %458, %475 : vector<8x26xf32>
    %477 = arith.cmpf ole, %214, %313 : vector<8x26xf32>
    %478 = arith.andi %477, %462 : vector<8x26xi1>
    %cst_83 = arith.constant dense<true> : vector<8x26xi1>
    %479 = arith.xori %477, %cst_83 : vector<8x26xi1>
    %480 = arith.andi %462, %479 : vector<8x26xi1>
    %cst_84 = arith.constant 1.000000e+00 : f32
    %481 = vector.broadcast %cst_84 : f32 to vector<8x26xf32>
    %482 = arith.cmpf olt, %214, %481 : vector<8x26xf32>
    %cst_85 = arith.constant dense<true> : vector<8x26xi1>
    %483 = arith.xori %478, %cst_85 : vector<8x26xi1>
    %484 = arith.andi %482, %483 : vector<8x26xi1>
    %485 = vector.extract_strided_slice %74 {offsets = [9, 0, 0], sizes = [1, 8, 26], strides = [1, 1, 1]} : vector<16x8x26xf32> to vector<1x8x26xf32>
    %486 = vector.shape_cast %485 : vector<1x8x26xf32> to vector<8x26xf32>
    %cst_86 = arith.constant 1.000000e+04 : f32
    %487 = vector.broadcast %cst_86 : f32 to vector<8x26xf32>
    %488 = arith.subf %486, %487 : vector<8x26xf32>
    %489 = vector.extract_strided_slice %74 {offsets = [9, 0, 0], sizes = [1, 8, 26], strides = [1, 1, 1]} : vector<16x8x26xf32> to vector<1x8x26xf32>
    %490 = vector.shape_cast %489 : vector<1x8x26xf32> to vector<8x26xf32>
    %491 = arith.select %484, %488, %490 : vector<8x26xi1>, vector<8x26xf32>
    %cst_87 = arith.constant 0.000000e+00 : f32
    %492 = vector.broadcast %cst_87 : f32 to vector<8x26xf32>
    %493 = arith.select %478, %491, %492 : vector<8x26xi1>, vector<8x26xf32>
    %494 = arith.addf %476, %493 : vector<8x26xf32>
    %495 = arith.cmpf ole, %228, %313 : vector<8x26xf32>
    %496 = arith.andi %495, %480 : vector<8x26xi1>
    %cst_88 = arith.constant dense<true> : vector<8x26xi1>
    %497 = arith.xori %495, %cst_88 : vector<8x26xi1>
    %498 = arith.andi %480, %497 : vector<8x26xi1>
    %cst_89 = arith.constant 1.000000e+00 : f32
    %499 = vector.broadcast %cst_89 : f32 to vector<8x26xf32>
    %500 = arith.cmpf olt, %228, %499 : vector<8x26xf32>
    %cst_90 = arith.constant dense<true> : vector<8x26xi1>
    %501 = arith.xori %496, %cst_90 : vector<8x26xi1>
    %502 = arith.andi %500, %501 : vector<8x26xi1>
    %503 = vector.extract_strided_slice %74 {offsets = [10, 0, 0], sizes = [1, 8, 26], strides = [1, 1, 1]} : vector<16x8x26xf32> to vector<1x8x26xf32>
    %504 = vector.shape_cast %503 : vector<1x8x26xf32> to vector<8x26xf32>
    %cst_91 = arith.constant 1.000000e+04 : f32
    %505 = vector.broadcast %cst_91 : f32 to vector<8x26xf32>
    %506 = arith.subf %504, %505 : vector<8x26xf32>
    %507 = vector.extract_strided_slice %74 {offsets = [10, 0, 0], sizes = [1, 8, 26], strides = [1, 1, 1]} : vector<16x8x26xf32> to vector<1x8x26xf32>
    %508 = vector.shape_cast %507 : vector<1x8x26xf32> to vector<8x26xf32>
    %509 = arith.select %502, %506, %508 : vector<8x26xi1>, vector<8x26xf32>
    %cst_92 = arith.constant 0.000000e+00 : f32
    %510 = vector.broadcast %cst_92 : f32 to vector<8x26xf32>
    %511 = arith.select %496, %509, %510 : vector<8x26xi1>, vector<8x26xf32>
    %512 = arith.addf %494, %511 : vector<8x26xf32>
    %513 = arith.cmpf ole, %242, %313 : vector<8x26xf32>
    %514 = arith.andi %513, %498 : vector<8x26xi1>
    %cst_93 = arith.constant dense<true> : vector<8x26xi1>
    %515 = arith.xori %513, %cst_93 : vector<8x26xi1>
    %516 = arith.andi %498, %515 : vector<8x26xi1>
    %cst_94 = arith.constant 1.000000e+00 : f32
    %517 = vector.broadcast %cst_94 : f32 to vector<8x26xf32>
    %518 = arith.cmpf olt, %242, %517 : vector<8x26xf32>
    %cst_95 = arith.constant dense<true> : vector<8x26xi1>
    %519 = arith.xori %514, %cst_95 : vector<8x26xi1>
    %520 = arith.andi %518, %519 : vector<8x26xi1>
    %521 = vector.extract_strided_slice %74 {offsets = [11, 0, 0], sizes = [1, 8, 26], strides = [1, 1, 1]} : vector<16x8x26xf32> to vector<1x8x26xf32>
    %522 = vector.shape_cast %521 : vector<1x8x26xf32> to vector<8x26xf32>
    %cst_96 = arith.constant 1.000000e+04 : f32
    %523 = vector.broadcast %cst_96 : f32 to vector<8x26xf32>
    %524 = arith.subf %522, %523 : vector<8x26xf32>
    %525 = vector.extract_strided_slice %74 {offsets = [11, 0, 0], sizes = [1, 8, 26], strides = [1, 1, 1]} : vector<16x8x26xf32> to vector<1x8x26xf32>
    %526 = vector.shape_cast %525 : vector<1x8x26xf32> to vector<8x26xf32>
    %527 = arith.select %520, %524, %526 : vector<8x26xi1>, vector<8x26xf32>
    %cst_97 = arith.constant 0.000000e+00 : f32
    %528 = vector.broadcast %cst_97 : f32 to vector<8x26xf32>
    %529 = arith.select %514, %527, %528 : vector<8x26xi1>, vector<8x26xf32>
    %530 = arith.addf %512, %529 : vector<8x26xf32>
    %531 = arith.cmpf ole, %256, %313 : vector<8x26xf32>
    %532 = arith.andi %531, %516 : vector<8x26xi1>
    %cst_98 = arith.constant dense<true> : vector<8x26xi1>
    %533 = arith.xori %531, %cst_98 : vector<8x26xi1>
    %534 = arith.andi %516, %533 : vector<8x26xi1>
    %cst_99 = arith.constant 1.000000e+00 : f32
    %535 = vector.broadcast %cst_99 : f32 to vector<8x26xf32>
    %536 = arith.cmpf olt, %256, %535 : vector<8x26xf32>
    %cst_100 = arith.constant dense<true> : vector<8x26xi1>
    %537 = arith.xori %532, %cst_100 : vector<8x26xi1>
    %538 = arith.andi %536, %537 : vector<8x26xi1>
    %539 = vector.extract_strided_slice %74 {offsets = [12, 0, 0], sizes = [1, 8, 26], strides = [1, 1, 1]} : vector<16x8x26xf32> to vector<1x8x26xf32>
    %540 = vector.shape_cast %539 : vector<1x8x26xf32> to vector<8x26xf32>
    %cst_101 = arith.constant 1.000000e+04 : f32
    %541 = vector.broadcast %cst_101 : f32 to vector<8x26xf32>
    %542 = arith.subf %540, %541 : vector<8x26xf32>
    %543 = vector.extract_strided_slice %74 {offsets = [12, 0, 0], sizes = [1, 8, 26], strides = [1, 1, 1]} : vector<16x8x26xf32> to vector<1x8x26xf32>
    %544 = vector.shape_cast %543 : vector<1x8x26xf32> to vector<8x26xf32>
    %545 = arith.select %538, %542, %544 : vector<8x26xi1>, vector<8x26xf32>
    %cst_102 = arith.constant 0.000000e+00 : f32
    %546 = vector.broadcast %cst_102 : f32 to vector<8x26xf32>
    %547 = arith.select %532, %545, %546 : vector<8x26xi1>, vector<8x26xf32>
    %548 = arith.addf %530, %547 : vector<8x26xf32>
    %549 = arith.cmpf ole, %270, %313 : vector<8x26xf32>
    %550 = arith.andi %549, %534 : vector<8x26xi1>
    %cst_103 = arith.constant dense<true> : vector<8x26xi1>
    %551 = arith.xori %549, %cst_103 : vector<8x26xi1>
    %552 = arith.andi %534, %551 : vector<8x26xi1>
    %cst_104 = arith.constant 1.000000e+00 : f32
    %553 = vector.broadcast %cst_104 : f32 to vector<8x26xf32>
    %554 = arith.cmpf olt, %270, %553 : vector<8x26xf32>
    %cst_105 = arith.constant dense<true> : vector<8x26xi1>
    %555 = arith.xori %550, %cst_105 : vector<8x26xi1>
    %556 = arith.andi %554, %555 : vector<8x26xi1>
    %557 = vector.extract_strided_slice %74 {offsets = [13, 0, 0], sizes = [1, 8, 26], strides = [1, 1, 1]} : vector<16x8x26xf32> to vector<1x8x26xf32>
    %558 = vector.shape_cast %557 : vector<1x8x26xf32> to vector<8x26xf32>
    %cst_106 = arith.constant 1.000000e+04 : f32
    %559 = vector.broadcast %cst_106 : f32 to vector<8x26xf32>
    %560 = arith.subf %558, %559 : vector<8x26xf32>
    %561 = vector.extract_strided_slice %74 {offsets = [13, 0, 0], sizes = [1, 8, 26], strides = [1, 1, 1]} : vector<16x8x26xf32> to vector<1x8x26xf32>
    %562 = vector.shape_cast %561 : vector<1x8x26xf32> to vector<8x26xf32>
    %563 = arith.select %556, %560, %562 : vector<8x26xi1>, vector<8x26xf32>
    %cst_107 = arith.constant 0.000000e+00 : f32
    %564 = vector.broadcast %cst_107 : f32 to vector<8x26xf32>
    %565 = arith.select %550, %563, %564 : vector<8x26xi1>, vector<8x26xf32>
    %566 = arith.addf %548, %565 : vector<8x26xf32>
    %567 = arith.cmpf ole, %284, %313 : vector<8x26xf32>
    %568 = arith.andi %567, %552 : vector<8x26xi1>
    %cst_108 = arith.constant dense<true> : vector<8x26xi1>
    %569 = arith.xori %567, %cst_108 : vector<8x26xi1>
    %570 = arith.andi %552, %569 : vector<8x26xi1>
    %cst_109 = arith.constant 1.000000e+00 : f32
    %571 = vector.broadcast %cst_109 : f32 to vector<8x26xf32>
    %572 = arith.cmpf olt, %284, %571 : vector<8x26xf32>
    %cst_110 = arith.constant dense<true> : vector<8x26xi1>
    %573 = arith.xori %568, %cst_110 : vector<8x26xi1>
    %574 = arith.andi %572, %573 : vector<8x26xi1>
    %575 = vector.extract_strided_slice %74 {offsets = [14, 0, 0], sizes = [1, 8, 26], strides = [1, 1, 1]} : vector<16x8x26xf32> to vector<1x8x26xf32>
    %576 = vector.shape_cast %575 : vector<1x8x26xf32> to vector<8x26xf32>
    %cst_111 = arith.constant 1.000000e+04 : f32
    %577 = vector.broadcast %cst_111 : f32 to vector<8x26xf32>
    %578 = arith.subf %576, %577 : vector<8x26xf32>
    %579 = vector.extract_strided_slice %74 {offsets = [14, 0, 0], sizes = [1, 8, 26], strides = [1, 1, 1]} : vector<16x8x26xf32> to vector<1x8x26xf32>
    %580 = vector.shape_cast %579 : vector<1x8x26xf32> to vector<8x26xf32>
    %581 = arith.select %574, %578, %580 : vector<8x26xi1>, vector<8x26xf32>
    %cst_112 = arith.constant 0.000000e+00 : f32
    %582 = vector.broadcast %cst_112 : f32 to vector<8x26xf32>
    %583 = arith.select %568, %581, %582 : vector<8x26xi1>, vector<8x26xf32>
    %584 = arith.addf %566, %583 : vector<8x26xf32>
    %585 = arith.cmpf ole, %298, %313 : vector<8x26xf32>
    %586 = arith.andi %585, %570 : vector<8x26xi1>
    %cst_113 = arith.constant 1.000000e+00 : f32
    %587 = vector.broadcast %cst_113 : f32 to vector<8x26xf32>
    %588 = arith.cmpf olt, %298, %587 : vector<8x26xf32>
    %cst_114 = arith.constant dense<true> : vector<8x26xi1>
    %589 = arith.xori %586, %cst_114 : vector<8x26xi1>
    %590 = arith.andi %588, %589 : vector<8x26xi1>
    %591 = vector.extract_strided_slice %74 {offsets = [15, 0, 0], sizes = [1, 8, 26], strides = [1, 1, 1]} : vector<16x8x26xf32> to vector<1x8x26xf32>
    %592 = vector.shape_cast %591 : vector<1x8x26xf32> to vector<8x26xf32>
    %cst_115 = arith.constant 1.000000e+04 : f32
    %593 = vector.broadcast %cst_115 : f32 to vector<8x26xf32>
    %594 = arith.subf %592, %593 : vector<8x26xf32>
    %595 = vector.extract_strided_slice %74 {offsets = [15, 0, 0], sizes = [1, 8, 26], strides = [1, 1, 1]} : vector<16x8x26xf32> to vector<1x8x26xf32>
    %596 = vector.shape_cast %595 : vector<1x8x26xf32> to vector<8x26xf32>
    %597 = arith.select %590, %594, %596 : vector<8x26xi1>, vector<8x26xf32>
    %cst_116 = arith.constant 0.000000e+00 : f32
    %598 = vector.broadcast %cst_116 : f32 to vector<8x26xf32>
    %599 = arith.select %586, %597, %598 : vector<8x26xi1>, vector<8x26xf32>
    %600 = arith.addf %584, %599 : vector<8x26xf32>
    %601 = arith.maximumf %330, %347 : vector<8x26xf32>
    %602 = arith.maximumf %601, %365 : vector<8x26xf32>
    %603 = arith.maximumf %602, %383 : vector<8x26xf32>
    %604 = arith.maximumf %603, %401 : vector<8x26xf32>
    %605 = arith.maximumf %604, %419 : vector<8x26xf32>
    %606 = arith.maximumf %605, %437 : vector<8x26xf32>
    %607 = arith.maximumf %606, %455 : vector<8x26xf32>
    %608 = arith.maximumf %607, %473 : vector<8x26xf32>
    %609 = arith.maximumf %608, %491 : vector<8x26xf32>
    %610 = arith.maximumf %609, %509 : vector<8x26xf32>
    %611 = arith.maximumf %610, %527 : vector<8x26xf32>
    %612 = arith.maximumf %611, %545 : vector<8x26xf32>
    %613 = arith.maximumf %612, %563 : vector<8x26xf32>
    %614 = arith.maximumf %613, %581 : vector<8x26xf32>
    %615 = arith.maximumf %614, %597 : vector<8x26xf32>
    %616 = arith.subf %330, %615 : vector<8x26xf32>
    %617 = math.exp %616 : vector<8x26xf32>
    %618 = arith.subf %347, %615 : vector<8x26xf32>
    %619 = math.exp %618 : vector<8x26xf32>
    %620 = arith.addf %617, %619 : vector<8x26xf32>
    %621 = arith.subf %365, %615 : vector<8x26xf32>
    %622 = math.exp %621 : vector<8x26xf32>
    %623 = arith.addf %620, %622 : vector<8x26xf32>
    %624 = arith.subf %383, %615 : vector<8x26xf32>
    %625 = math.exp %624 : vector<8x26xf32>
    %626 = arith.addf %623, %625 : vector<8x26xf32>
    %627 = arith.subf %401, %615 : vector<8x26xf32>
    %628 = math.exp %627 : vector<8x26xf32>
    %629 = arith.addf %626, %628 : vector<8x26xf32>
    %630 = arith.subf %419, %615 : vector<8x26xf32>
    %631 = math.exp %630 : vector<8x26xf32>
    %632 = arith.addf %629, %631 : vector<8x26xf32>
    %633 = arith.subf %437, %615 : vector<8x26xf32>
    %634 = math.exp %633 : vector<8x26xf32>
    %635 = arith.addf %632, %634 : vector<8x26xf32>
    %636 = arith.subf %455, %615 : vector<8x26xf32>
    %637 = math.exp %636 : vector<8x26xf32>
    %638 = arith.addf %635, %637 : vector<8x26xf32>
    %639 = arith.subf %473, %615 : vector<8x26xf32>
    %640 = math.exp %639 : vector<8x26xf32>
    %641 = arith.addf %638, %640 : vector<8x26xf32>
    %642 = arith.subf %491, %615 : vector<8x26xf32>
    %643 = math.exp %642 : vector<8x26xf32>
    %644 = arith.addf %641, %643 : vector<8x26xf32>
    %645 = arith.subf %509, %615 : vector<8x26xf32>
    %646 = math.exp %645 : vector<8x26xf32>
    %647 = arith.addf %644, %646 : vector<8x26xf32>
    %648 = arith.subf %527, %615 : vector<8x26xf32>
    %649 = math.exp %648 : vector<8x26xf32>
    %650 = arith.addf %647, %649 : vector<8x26xf32>
    %651 = arith.subf %545, %615 : vector<8x26xf32>
    %652 = math.exp %651 : vector<8x26xf32>
    %653 = arith.addf %650, %652 : vector<8x26xf32>
    %654 = arith.subf %563, %615 : vector<8x26xf32>
    %655 = math.exp %654 : vector<8x26xf32>
    %656 = arith.addf %653, %655 : vector<8x26xf32>
    %657 = arith.subf %581, %615 : vector<8x26xf32>
    %658 = math.exp %657 : vector<8x26xf32>
    %659 = arith.addf %656, %658 : vector<8x26xf32>
    %660 = arith.subf %597, %615 : vector<8x26xf32>
    %661 = math.exp %660 : vector<8x26xf32>
    %662 = arith.addf %659, %661 : vector<8x26xf32>
    %663 = math.log %662 : vector<8x26xf32>
    %664 = arith.addf %615, %663 : vector<8x26xf32>
    %665 = arith.subf %664, %600 : vector<8x26xf32>
    %666 = arith.subf %35, %13 : vector<8x26xf32>
    %667 = arith.subf %45, %15 : vector<8x26xf32>
    %668 = arith.subf %55, %17 : vector<8x26xf32>
    %669 = arith.mulf %666, %666 : vector<8x26xf32>
    %670 = arith.mulf %667, %667 : vector<8x26xf32>
    %671 = arith.addf %669, %670 : vector<8x26xf32>
    %672 = arith.mulf %668, %668 : vector<8x26xf32>
    %673 = arith.addf %671, %672 : vector<8x26xf32>
    %674 = math.sqrt %673 : vector<8x26xf32>
    %cst_117 = arith.constant 2.500000e-01 : f32
    %675 = vector.broadcast %cst_117 : f32 to vector<8x26xf32>
    %676 = arith.cmpf olt, %673, %675 : vector<8x26xf32>
    %cst_118 = arith.constant 1.000000e+00 : f32
    %677 = vector.broadcast %cst_118 : f32 to vector<8x26xf32>
    %678 = arith.cmpf olt, %673, %677 : vector<8x26xf32>
    %679 = arith.xori %676, %678 : vector<8x26xi1>
    %cst_119 = arith.constant 0.000000e+00 : f32
    %680 = vector.broadcast %cst_119 : f32 to vector<8x26xf32>
    %681 = arith.select %679, %680, %67 : vector<8x26xi1>, vector<8x26xf32>
    %682 = arith.extui %676 : vector<8x26xi1> to vector<8x26xi32>
    %683 = arith.sitofp %682 : vector<8x26xi32> to vector<8x26xf32>
    %684 = math.log %25 : vector<8x26xf32>
    %cst_120 = arith.constant -1.000000e+02 : f32
    %685 = vector.broadcast %cst_120 : f32 to vector<8x26xf32>
    %686 = arith.maximumf %684, %685 : vector<8x26xf32>
    %cst_121 = arith.constant 1.000000e+00 : f32
    %687 = vector.broadcast %cst_121 : f32 to vector<8x26xf32>
    %688 = arith.subf %687, %25 : vector<8x26xf32>
    %689 = math.log %688 : vector<8x26xf32>
    %cst_122 = arith.constant -1.000000e+02 : f32
    %690 = vector.broadcast %cst_122 : f32 to vector<8x26xf32>
    %691 = arith.maximumf %689, %690 : vector<8x26xf32>
    %cst_123 = arith.constant 0.000000e+00 : f32
    %692 = vector.broadcast %cst_123 : f32 to vector<8x26xf32>
    %693 = arith.subf %692, %681 : vector<8x26xf32>
    %694 = arith.mulf %683, %686 : vector<8x26xf32>
    %cst_124 = arith.constant 1.000000e+00 : f32
    %695 = vector.broadcast %cst_124 : f32 to vector<8x26xf32>
    %696 = arith.subf %695, %683 : vector<8x26xf32>
    %697 = arith.mulf %696, %691 : vector<8x26xf32>
    %698 = arith.addf %694, %697 : vector<8x26xf32>
    %699 = arith.mulf %693, %698 : vector<8x26xf32>
    %cst_125 = arith.constant dense<0.000000e+00> : vector<26xf32>
    %700 = vector.multi_reduction <add>, %317, %cst_125 [0] : vector<8x26xf32> to vector<26xf32>
    %701 = vector.shape_cast %700 : vector<26xf32> to vector<1x26xf32>
    %c0_126 = arith.constant 0 : index
    %c0_127 = arith.constant 0 : index
    %702 = vector.load %arg5[%c0_126, %c0_127] : memref<4x26xf32, #tpu.memory_space<vmem>>, vector<1x26xf32>
    tpu.vector_store %arg5[%c0_126, %c0_127], %701 {strides = array<i32>} : memref<4x26xf32, #tpu.memory_space<vmem>>, vector<1x26xf32>,
    %703 = arith.mulf %665, %317 : vector<8x26xf32>
    %cst_128 = arith.constant dense<0.000000e+00> : vector<26xf32>
    %704 = vector.multi_reduction <add>, %703, %cst_128 [0] : vector<8x26xf32> to vector<26xf32>
    %705 = vector.shape_cast %704 : vector<26xf32> to vector<1x26xf32>
    %c1_129 = arith.constant 1 : index
    %c0_130 = arith.constant 0 : index
    %706 = vector.load %arg5[%c1_129, %c0_130] : memref<4x26xf32, #tpu.memory_space<vmem>>, vector<1x26xf32>
    tpu.vector_store %arg5[%c1_129, %c0_130], %705 {strides = array<i32>} : memref<4x26xf32, #tpu.memory_space<vmem>>, vector<1x26xf32>,
    %707 = arith.mulf %674, %317 : vector<8x26xf32>
    %cst_131 = arith.constant dense<0.000000e+00> : vector<26xf32>
    %708 = vector.multi_reduction <add>, %707, %cst_131 [0] : vector<8x26xf32> to vector<26xf32>
    %709 = vector.shape_cast %708 : vector<26xf32> to vector<1x26xf32>
    %c2_132 = arith.constant 2 : index
    %c0_133 = arith.constant 0 : index
    %710 = vector.load %arg5[%c2_132, %c0_133] : memref<4x26xf32, #tpu.memory_space<vmem>>, vector<1x26xf32>
    tpu.vector_store %arg5[%c2_132, %c0_133], %709 {strides = array<i32>} : memref<4x26xf32, #tpu.memory_space<vmem>>, vector<1x26xf32>,
    %cst_134 = arith.constant dense<0.000000e+00> : vector<26xf32>
    %711 = vector.multi_reduction <add>, %699, %cst_134 [0] : vector<8x26xf32> to vector<26xf32>
    %712 = vector.shape_cast %711 : vector<26xf32> to vector<1x26xf32>
    %c3_135 = arith.constant 3 : index
    %c0_136 = arith.constant 0 : index
    %713 = vector.load %arg5[%c3_135, %c0_136] : memref<4x26xf32, #tpu.memory_space<vmem>>, vector<1x26xf32>
    tpu.vector_store %arg5[%c3_135, %c0_136], %712 {strides = array<i32>} : memref<4x26xf32, #tpu.memory_space<vmem>>, vector<1x26xf32>,
    return
  }
  func.func @transform_0(%arg0: i32) -> (i32, i32, i32) {
    %c0_i32 = arith.constant 0 : i32
    %c0_i32_0 = arith.constant 0 : i32
    %c0_i32_1 = arith.constant 0 : i32
    return %c0_i32, %c0_i32_0, %arg0 : i32, i32, i32
  }
  func.func @transform_1(%arg0: i32) -> (i32, i32, i32, i32) {
    %c0_i32 = arith.constant 0 : i32
    %c0_i32_0 = arith.constant 0 : i32
    %c0_i32_1 = arith.constant 0 : i32
    %c0_i32_2 = arith.constant 0 : i32
    return %c0_i32, %c0_i32_0, %c0_i32_1, %arg0 : i32, i32, i32, i32
  }
  func.func @transform_2(%arg0: i32) -> (i32, i32, i32) {
    %c0_i32 = arith.constant 0 : i32
    %c0_i32_0 = arith.constant 0 : i32
    %c0_i32_1 = arith.constant 0 : i32
    return %c0_i32, %c0_i32_0, %arg0 : i32, i32, i32
  }
  func.func @transform_3(%arg0: i32) -> i32 {
    %c0_i32 = arith.constant 0 : i32
    %c0_i32_0 = arith.constant 0 : i32
    return %c0_i32 : i32
  }
  func.func @transform_4(%arg0: i32) -> (i32, i32) {
    %c0_i32 = arith.constant 0 : i32
    %c0_i32_0 = arith.constant 0 : i32
    return %c0_i32, %arg0 : i32, i32
  }
}

</mosaic_0001>

<bundles_post_ra>
// kernel: tpu_custom_call.1
= control target key start
LH: loop header
LB: loop body
LE: loop exit
PB: predicated region body
PF: predicated region fallthrough
CT: control target
= control target key end

     0   :  { %9 = vsyncpa [#allocation3], 0  ;;  %s1564_s0 = inlined_call_operand.hbm [shape: f32[8,8,26], index: 0, kind: input, shape index: {}]   ;;  %s1565_s1 = inlined_call_operand.hbm [shape: f32[3,16,8,26], index: 1, kind: input, shape index: {}]   ;;  %s1566_s2 = inlined_call_operand.hbm [shape: f32[16,8,26], index: 2, kind: input, shape index: {}]   ;;  %s1567_s3 = inlined_call_operand.vmem [shape: f32[16], index: 3, kind: input, shape index: {}]   ;;  %s1568_s4 = inlined_call_operand.hbm [shape: f32[4,26], index: 4, kind: output, shape index: {}]  }
   0x1   :  { %10 = vsyncpa [#allocation7], 0 }
   0x2   :  { %11 = vsyncpa [#allocation5], 0 }
   0x3   :  { %12 = vsyncpa [#allocation4], 0  ;;  %s875_s15 = smov [#allocation6]   ;;  %s876_s17 = smov [#allocation2]  }
   0x4   :  { %s30_s16 = sshll.u32 %s875_s15, 4  ;;  %s18_s18 = sshll.u32 %s876_s17, 4  ;;  %s31_s16 = int_to_ptr.vmem [resolvable:$true] %s30_s16  ;;  %s909_s18 = int_to_ptr.vmem [resolvable:$true] %s18_s18 }
   0x5   :  { %s767_s21 = scalar_lea.hbm %s1565_s1, 6144 }
   0x6   :  { %p768_p0 = scmp.ne.s32.totalorder %s1565_s1, %s767_s21  ;;  %p771_p1 = scmp.lt.u32.totalorder %s767_s21, %s1565_s1 }
   0x8   :  { %p773_p2 = pnand %p771_p1, %p768_p0 }
   0xa   :  { %776 = shalt.err (!%p773_p2)
}
   0xb   :  { %s777_s26 = scalar_lea.vmem %s31_s16, 6144  ;;  %p782_p4 = scmp.lt.s32.totalorder %s31_s16, %s31_s16 }
   0xc   :  { %p778_p3 = scmp.ne.s32.totalorder %s31_s16, %s777_s26  ;;  %p783_p5 = scmp.lt.s32.totalorder %s777_s26, %s777_s26 }
   0xe   :  { %p784_p6 = por %p783_p5, %p782_p4 }
  0x10   :  { %p785_p7 = pnand %p784_p6, %p778_p3 }
  0x12   :  { %788 = shalt.err (!%p785_p7)
}
  0x13   :  { %s877_s27 = smov 128   ;;  %s878_s28 = smov 8  }
  0x14   :  { %36 = dma.hbm_to_vmem [thread:$0]  %s1565_s1, 6144, %s31_s16, [#allocation7], %s877_s27, %s877_s27, %s878_s28  }
  0x15   :  { %s789_s7 = scalar_lea.hbm %s1564_s0, 1024 }
  0x16   :  { %p790_p8 = scmp.ne.s32.totalorder %s1564_s0, %s789_s7  ;;  %p793_p9 = scmp.lt.u32.totalorder %s789_s7, %s1564_s0 }
  0x18   :  { %p795_p10 = pnand %p793_p9, %p790_p8 }
  0x1a   :  { %798 = shalt.err (!%p795_p10)
}
  0x1b   :  { %s799_s12 = scalar_lea.vmem %s909_s18, 1024  ;;  %p804_p12 = scmp.lt.s32.totalorder %s909_s18, %s909_s18 }
  0x1c   :  { %p800_p11 = scmp.ne.s32.totalorder %s909_s18, %s799_s12  ;;  %p805_p13 = scmp.lt.s32.totalorder %s799_s12, %s799_s12 }
  0x1e   :  { %p806_p0 = por %p805_p13, %p804_p12 }
  0x20   :  { %p807_p1 = pnand %p806_p0, %p800_p11 }
  0x22   :  { %810 = shalt.err (!%p807_p1)
}
  0x23   :  { %24 = dma.hbm_to_vmem [thread:$0]  %s1564_s0, 1024, %s909_s18, [#allocation3], %s877_s27, %s877_s27, %s878_s28  }
  0x24   :  { %s55_s16 = sshll.u32 %s1567_s3, 4  ;;  %s879_s17 = smov [#allocation8]   ;;  %s56_s16 = int_to_ptr.vmem [resolvable:$true] %s55_s16 }
  0x25   :  { %s42_s19 = sshll.u32 %s879_s17, 4  ;;  %s811_s22 = scalar_lea.hbm %s1566_s2, 2048  ;;  %s43_s19 = int_to_ptr.vmem [resolvable:$true] %s42_s19 }
  0x26   :  { %p812_p2 = scmp.ne.s32.totalorder %s1566_s2, %s811_s22  ;;  %p815_p3 = scmp.lt.u32.totalorder %s811_s22, %s1566_s2 }
  0x28   :  { %p817_p4 = pnand %p815_p3, %p812_p2 }
  0x2a   :  { %820 = shalt.err (!%p817_p4)
}
  0x2b   :  { %s821_s0 = scalar_lea.vmem %s43_s19, 2048  ;;  %p826_p6 = scmp.lt.s32.totalorder %s43_s19, %s43_s19 }
  0x2c   :  { %p822_p5 = scmp.ne.s32.totalorder %s43_s19, %s821_s0  ;;  %p827_p7 = scmp.lt.s32.totalorder %s821_s0, %s821_s0 }
  0x2e   :  { %p828_p8 = por %p827_p7, %p826_p6 }
  0x30   :  { %p829_p9 = pnand %p828_p8, %p822_p5 }
  0x32   :  { %832 = shalt.err (!%p829_p9)
}
  0x33   :  { %48 = dma.hbm_to_vmem [thread:$0]  %s1566_s2, 2048, %s43_s19, [#allocation7], %s877_s27, %s877_s27, %s878_s28  }
  0x34   :  { %s833_s29 = scalar_lea.vmem %s56_s16, 16  ;;  %p838_p11 = scmp.lt.s32.totalorder %s56_s16, %s56_s16 }
  0x35   :  { %p834_p10 = scmp.ne.s32.totalorder %s56_s16, %s833_s29  ;;  %p839_p12 = scmp.lt.s32.totalorder %s833_s29, %s833_s29 }
  0x37   :  { %p840_p13 = por %p839_p12, %p838_p11 }
  0x39   :  { %p841_p0 = pnand %p840_p13, %p834_p10 }
  0x3b   :  { %844 = shalt.err (!%p841_p0)
}
  0x3c   :  { %s880_s30 = smov [#allocation9]  }
  0x3d   :  { %58 = dma.vmem_to_smem %s56_s16, 16, %s880_s30, [#allocation5]  }
  0x3e   :  { %867 = dma.done.wait [#allocation3], 1024  }
  0x3f   :  { %868 = vsyncadd [#allocation3], 4294966272 }
  0x40   :  { %869 = dma.done.wait [#allocation7], 8192  }
  0x41   :  { %870 = vsyncadd [#allocation7], 4294959104 }
  0x42   :  { %871 = dma.done.wait [#allocation5], 16  }
  0x43   :  { %872 = vsyncadd [#allocation5], 4294967280 }
  0x44   :  { %71 = sfence }
  0x45   :  { %s72_s5 = sld [smem:[#allocation9]]  ;;  %s689_s6 = sld [smem:[#allocation9 + $0x1]]  ;;  %v90_v0 = vld [vmem:[#allocation2 + $0x18] sm:$0xff]  ;;  %v92_v1 = vld [vmem:[#allocation2 + $0x20] sm:$0xff]  ;;  %v94_v8 = vld [vmem:[#allocation2 + $0x28] sm:$0xff]  ;;  %vm881_vm2 = vmmov 1  }
  0x46   :  { %s692_s7 = sld [smem:[#allocation9 + $0x4]]  ;;  %s693_s2 = sld [smem:[#allocation9 + $0x5]]  ;;  %v139_v32 = vld [vmem:[#allocation6] sm:$0xff]  ;;  %v140_v34 = vld [vmem:[#allocation6 + $0x8] sm:$0xff]  ;;  %v141_v35 = vld [vmem:[#allocation6 + $0x10] sm:$0xff] }
  0x47   :  { %s690_s27 = sld [smem:[#allocation9 + $0x2]]  ;;  %s694_s28 = sld [smem:[#allocation9 + $0x6]]  ;;  %v156_v33 = vld [vmem:[#allocation6 + $0x80] sm:$0xff]  ;;  %v157_v36 = vld [vmem:[#allocation6 + $0x88] sm:$0xff]  ;;  %v158_v37 = vld [vmem:[#allocation6 + $0x90] sm:$0xff] }
  0x48   :  { %s696_s8 = sld [smem:[#allocation9 + $0x8]]  ;;  %s697_s9 = sld [smem:[#allocation9 + $0x9]]  ;;  %v142_v39 = vld [vmem:[#allocation6 + $0x18] sm:$0xff]  ;;  %v143_v42 = vld [vmem:[#allocation6 + $0x20] sm:$0xff]  ;;  %v174_v50 = vld [vmem:[#allocation6 + $0x108] sm:$0xff] }
  0x49   :  { %s698_s10 = sld [smem:[#allocation9 + $0xa]]  ;;  %s691_s11 = sld [smem:[#allocation9 + $0x3]]  ;;  %v173_v43 = vld [vmem:[#allocation6 + $0x100] sm:$0xff]  ;;  %v159_v46 = vld [vmem:[#allocation6 + $0x98] sm:$0xff]  ;;  %v175_v51 = vld [vmem:[#allocation6 + $0x110] sm:$0xff] }
  0x4a   :  { %s695_s12 = sld [smem:[#allocation9 + $0x7]]  ;;  %s699_s1 = sld [smem:[#allocation9 + $0xb]]  ;;  %v160_v47 = vld [vmem:[#allocation6 + $0xa0] sm:$0xff]  ;;  %v144_v53 = vld [vmem:[#allocation6 + $0x28] sm:$0xff]  ;;  %v176_v55 = vld [vmem:[#allocation6 + $0x118] sm:$0xff] }
  0x4b   :  { %v97_v2 = vstv %s72_s5  ;;  %v99_v3 = vstv %s689_s6  ;;  %v161_v54 = vld [vmem:[#allocation6 + $0xa8] sm:$0xff]  ;;  %v145_v60 = vld [vmem:[#allocation6 + $0x30] sm:$0xff]  ;;  %s883_s13 = smov [#allocation10]  }
  0x4c   :  { %v107_v4 = vstv %s692_s7  ;;  %v109_v5 = vstv %s693_s2  ;;  %v98_v6 = vmul.f32 %v97_v2, %v90_v0  ;;  %v100_v7 = vmul.f32 %v99_v3, %v92_v1  ;;  %v162_v61 = vld [vmem:[#allocation6 + $0xb0] sm:$0xff]  ;;  %v177_v2 = vld [vmem:[#allocation6 + $0x120] sm:$0xff]  ;;  %s678_s14 = sshll.u32 %s883_s13, 4  ;;  %s679_s14 = int_to_ptr.vmem [resolvable:$true] %s678_s14 }
  0x4d   :  { %v102_v9 = vstv %s690_s27  ;;  %v108_v10 = vmul.f32 %v107_v4, %v90_v0  ;;  %v110_v11 = vmul.f32 %v109_v5, %v92_v1  ;;  %v112_v12 = vstv %s694_s28  ;;  %s845_s15 = scalar_lea.vmem %s679_s14, 64  ;;  %p850_p2 = scmp.lt.s32.totalorder %s679_s14, %s679_s14 }
  0x4e   :  { %v117_v13 = vstv %s696_s8  ;;  %v119_v14 = vstv %s697_s9  ;;  %v101_v15 = vadd.f32 %v100_v7, %v98_v6  ;;  %v103_v16 = vmul.f32 %v102_v9, %v94_v8  ;;  %p846_p1 = scmp.ne.s32.totalorder %s679_s14, %s845_s15  ;;  %p851_p3 = scmp.lt.s32.totalorder %s845_s15, %s845_s15 }
  0x4f   :  { %v111_v17 = vadd.f32 %v110_v11, %v108_v10  ;;  %v113_v18 = vmul.f32 %v112_v12, %v94_v8  ;;  %v118_v19 = vmul.f32 %v117_v13, %v90_v0  ;;  %v120_v20 = vmul.f32 %v119_v14, %v92_v1  ;;  %v178_v11 = vld [vmem:[#allocation6 + $0x128] sm:$0xff]  ;;  %v179_v12 = vld [vmem:[#allocation6 + $0x130] sm:$0xff] }
  0x50   :  { %v122_v21 = vstv %s698_s10  ;;  %v104_v22 = vadd.f32 %v103_v16, %v101_v15  ;;  %v105_v26 = vstv %s691_s11  ;;  %v115_v27 = vstv %s695_s12  ;;  %p852_p4 = por %p851_p3, %p850_p2 }
  0x51   :  { %v114_v23 = vadd.f32 %v113_v18, %v111_v17  ;;  %v121_v24 = vadd.f32 %v120_v20, %v118_v19  ;;  %v123_v25 = vmul.f32 %v122_v21, %v94_v8  ;;  %v125_v31 = vstv %s699_s1  ;;  %v146_v17 = vld [vmem:[#allocation6 + $0x38] sm:$0xff] }
  0x52   :  { %v964_v28 = vadd.f32 %v105_v26, %v104_v22  ;;  %v163_v18 = vld [vmem:[#allocation6 + $0xb8] sm:$0xff]  ;;  %p853_p5 = pnand %p852_p4, %p846_p1 }
  0x53   :  { %v966_v29 = vadd.f32 %v115_v27, %v114_v23  ;;  %v124_v30 = vadd.f32 %v123_v25, %v121_v24  ;;  %v147_v27 = vld [vmem:[#allocation6 + $0x40] sm:$0xff] }
  0x54   :  { %v205_v40 = vsub.f32 %v964_v28, %v139_v32  ;;  %v213_v44 = vsub.f32 %v964_v28, %v140_v34  ;;  %v221_v45 = vsub.f32 %v964_v28, %v141_v35  ;;  %v229_v52 = vsub.f32 %v964_v28, %v142_v39  ;;  %v180_v35 = vld [vmem:[#allocation6 + $0x138] sm:$0xff] }
  0x55   :  { %v968_v38 = vadd.f32 %v125_v31, %v124_v30  ;;  %v206_v41 = vsub.f32 %v966_v29, %v156_v33  ;;  %v214_v48 = vsub.f32 %v966_v29, %v157_v36  ;;  %v222_v49 = vsub.f32 %v966_v29, %v158_v37  ;;  %v164_v30 = vld [vmem:[#allocation6 + $0xc0] sm:$0xff] }
  0x56   :  { %v208_v57 = vmul.f32 %v205_v40, %v205_v40  ;;  %v237_v59 = vsub.f32 %v964_v28, %v143_v42  ;;  %v216_v62 = vmul.f32 %v213_v44, %v213_v44  ;;  %v224_v63 = vmul.f32 %v221_v45, %v221_v45  ;;  %v148_v45 = vld [vmem:[#allocation6 + $0x48] sm:$0xff] }
  0x57   :  { %v207_v56 = vsub.f32 %v968_v38, %v173_v43  ;;  %v209_v58 = vmul.f32 %v206_v41, %v206_v41  ;;  %v230_v0 = vsub.f32 %v966_v29, %v159_v46  ;;  %v238_v1 = vsub.f32 %v966_v29, %v160_v47  ;;  %v181_v46 = vld [vmem:[#allocation6 + $0x140] sm:$0xff] }
  0x58   :  { %v215_v3 = vsub.f32 %v968_v38, %v174_v50  ;;  %v217_v4 = vmul.f32 %v214_v48, %v214_v48  ;;  %v223_v5 = vsub.f32 %v968_v38, %v175_v51  ;;  %v225_v6 = vmul.f32 %v222_v49, %v222_v49  ;;  %v165_v51 = vld [vmem:[#allocation6 + $0xc8] sm:$0xff] }
  0x59   :  { %v231_v7 = vsub.f32 %v968_v38, %v176_v55  ;;  %v232_v8 = vmul.f32 %v229_v52, %v229_v52  ;;  %v245_v9 = vsub.f32 %v964_v28, %v144_v53  ;;  %v246_v10 = vsub.f32 %v966_v29, %v161_v54 }
  0x5a   :  { %v210_v13 = vadd.f32 %v209_v58, %v208_v57  ;;  %v211_v14 = vmul.f32 %v207_v56, %v207_v56  ;;  %v253_v15 = vsub.f32 %v964_v28, %v145_v60  ;;  %v254_v16 = vsub.f32 %v966_v29, %v162_v61  ;;  %v149_v56 = vld [vmem:[#allocation6 + $0x50] sm:$0xff] }
  0x5b   :  { %v233_v19 = vmul.f32 %v230_v0, %v230_v0  ;;  %v239_v20 = vsub.f32 %v968_v38, %v177_v2  ;;  %v240_v21 = vmul.f32 %v237_v59, %v237_v59  ;;  %v241_v22 = vmul.f32 %v238_v1, %v238_v1  ;;  %v166_v57 = vld [vmem:[#allocation6 + $0xd0] sm:$0xff] }
  0x5c   :  { %v218_v23 = vadd.f32 %v217_v4, %v216_v62  ;;  %v219_v24 = vmul.f32 %v215_v3, %v215_v3  ;;  %v226_v25 = vadd.f32 %v225_v6, %v224_v63  ;;  %v227_v26 = vmul.f32 %v223_v5, %v223_v5  ;;  %v182_v62 = vld [vmem:[#allocation6 + $0x148] sm:$0xff]  ;;  %v150_v3 = vld [vmem:[#allocation6 + $0x58] sm:$0xff] }
  0x5d   :  { %v247_v31 = vsub.f32 %v968_v38, %v178_v11  ;;  %v248_v32 = vmul.f32 %v245_v9, %v245_v9  ;;  %v249_v33 = vmul.f32 %v246_v10, %v246_v10  ;;  %v255_v34 = vsub.f32 %v968_v38, %v179_v12  ;;  %v167_v4 = vld [vmem:[#allocation6 + $0xd8] sm:$0xff]  ;;  %v183_v9 = vld [vmem:[#allocation6 + $0x150] sm:$0xff] }
  0x5e   :  { %v256_v36 = vmul.f32 %v253_v15, %v253_v15  ;;  %v257_v37 = vmul.f32 %v254_v16, %v254_v16  ;;  %v261_v39 = vsub.f32 %v964_v28, %v146_v17  ;;  %v262_v40 = vsub.f32 %v966_v29, %v163_v18  ;;  %v168_v15 = vld [vmem:[#allocation6 + $0xe0] sm:$0xff] }
  0x5f   :  { %v234_v41 = vadd.f32 %v233_v19, %v232_v8  ;;  %v235_v42 = vmul.f32 %v231_v7, %v231_v7  ;;  %v242_v43 = vadd.f32 %v241_v22, %v240_v21  ;;  %v243_v44 = vmul.f32 %v239_v20, %v239_v20  ;;  %v184_v20 = vld [vmem:[#allocation6 + $0x158] sm:$0xff] }
  0x60   :  { %v993_v47 = vadd.f32 %v211_v14, %v210_v13  ;;  %v995_v48 = vadd.f32 %v219_v24, %v218_v23  ;;  %v269_v49 = vsub.f32 %v964_v28, %v147_v27  ;;  %v270_v50 = vsub.f32 %v966_v29, %v164_v30  ;;  %v151_v14 = vld [vmem:[#allocation6 + $0x60] sm:$0xff] }
  0x61   :  { %v999_v52 = vadd.f32 %v227_v26, %v226_v25  ;;  %v250_v53 = vadd.f32 %v249_v33, %v248_v32  ;;  %v251_v54 = vmul.f32 %v247_v31, %v247_v31  ;;  %v263_v55 = vsub.f32 %v968_v38, %v180_v35  ;;  %v152_v25 = vld [vmem:[#allocation6 + $0x68] sm:$0xff] }
  0x62   :  { %v258_v58 = vadd.f32 %v257_v37, %v256_v36  ;;  %v259_v59 = vmul.f32 %v255_v34, %v255_v34  ;;  %v264_v60 = vmul.f32 %v261_v39, %v261_v39  ;;  %v265_v61 = vmul.f32 %v262_v40, %v262_v40  ;;  %v169_v26 = vld [vmem:[#allocation6 + $0xe8] sm:$0xff]  ;;  %v185_v37 = vld [vmem:[#allocation6 + $0x160] sm:$0xff] }
  0x63   :  { %v1002_v63 = vadd.f32 %v235_v42, %v234_v41  ;;  %v1004_v0 = vadd.f32 %v243_v44, %v242_v43  ;;  %v271_v1 = vsub.f32 %v968_v38, %v181_v46  ;;  %v277_v2 = vsub.f32 %v964_v28, %v148_v45  ;;  %v153_v43 = vld [vmem:[#allocation6 + $0x70] sm:$0xff] }
  0x64   :  { %v272_v5 = vmul.f32 %v269_v49, %v269_v49  ;;  %v273_v6 = vmul.f32 %v270_v50, %v270_v50  ;;  %v278_v7 = vsub.f32 %v966_v29, %v165_v51  ;;  %v333_v8 = vmin.f32 %v993_v47, %v995_v48  ;;  %v170_v44 = vld [vmem:[#allocation6 + $0xf0] sm:$0xff]  ;;  %v186_v51 = vld [vmem:[#allocation6 + $0x168] sm:$0xff] }
  0x65   :  { %v1011_v10 = vadd.f32 %v251_v54, %v250_v53  ;;  %v267_v11 = vmul.f32 %v263_v55, %v263_v55  ;;  %v285_v12 = vsub.f32 %v964_v28, %v149_v56  ;;  %v286_v13 = vsub.f32 %v966_v29, %v166_v57  ;;  %v154_v57 = vld [vmem:[#allocation6 + $0x78] sm:$0xff] }
  0x66   :  { %v1015_v16 = vadd.f32 %v259_v59, %v258_v58  ;;  %v266_v17 = vadd.f32 %v265_v61, %v264_v60  ;;  %v279_v18 = vsub.f32 %v968_v38, %v182_v62  ;;  %v334_v19 = vmin.f32 %v333_v8, %v999_v52  ;;  %v171_v58 = vld [vmem:[#allocation6 + $0xf8] sm:$0xff] }
  0x67   :  { %v275_v21 = vmul.f32 %v271_v1, %v271_v1  ;;  %v280_v22 = vmul.f32 %v277_v2, %v277_v2  ;;  %v293_v23 = vsub.f32 %v964_v28, %v150_v3  ;;  %v294_v24 = vsub.f32 %v966_v29, %v167_v4 }
  0x68   :  { %v274_v27 = vadd.f32 %v273_v6, %v272_v5  ;;  %v281_v30 = vmul.f32 %v278_v7, %v278_v7  ;;  %v287_v31 = vsub.f32 %v968_v38, %v183_v9  ;;  %v335_v32 = vmin.f32 %v334_v19, %v1002_v63  ;;  %v187_v5 = vld [vmem:[#allocation6 + $0x170] sm:$0xff] }
  0x69   :  { %v288_v33 = vmul.f32 %v285_v12, %v285_v12  ;;  %v289_v34 = vmul.f32 %v286_v13, %v286_v13  ;;  %v301_v35 = vsub.f32 %v964_v28, %v151_v14  ;;  %v302_v36 = vsub.f32 %v966_v29, %v168_v15  ;;  %v188_v15 = vld [vmem:[#allocation6 + $0x178] sm:$0xff] }
  0x6a   :  { %v1025_v39 = vadd.f32 %v267_v11, %v266_v17  ;;  %v283_v40 = vmul.f32 %v279_v18, %v279_v18  ;;  %v295_v41 = vsub.f32 %v968_v38, %v184_v20  ;;  %v336_v42 = vmin.f32 %v335_v32, %v1004_v0 }
  0x6b   :  { %v296_v45 = vmul.f32 %v293_v23, %v293_v23  ;;  %v297_v46 = vmul.f32 %v294_v24, %v294_v24  ;;  %v309_v49 = vsub.f32 %v964_v28, %v152_v25  ;;  %v310_v50 = vsub.f32 %v966_v29, %v169_v26 }
  0x6c   :  { %v1031_v53 = vadd.f32 %v275_v21, %v274_v27  ;;  %v282_v54 = vadd.f32 %v281_v30, %v280_v22  ;;  %v291_v55 = vmul.f32 %v287_v31, %v287_v31  ;;  %v337_v56 = vmin.f32 %v336_v42, %v1011_v10 }
  0x6d   :  { %v290_v59 = vadd.f32 %v289_v34, %v288_v33  ;;  %v303_v60 = vsub.f32 %v968_v38, %v185_v37  ;;  %v304_v61 = vmul.f32 %v301_v35, %v301_v35  ;;  %v305_v62 = vmul.f32 %v302_v36, %v302_v36  ;;  %v84_v37 = vld [vmem:[#allocation2] sm:$0xff] }
  0x6e   :  { %v299_v1 = vmul.f32 %v295_v41, %v295_v41  ;;  %v317_v2 = vsub.f32 %v964_v28, %v153_v43  ;;  %v318_v3 = vsub.f32 %v966_v29, %v170_v44  ;;  %v338_v4 = vmin.f32 %v337_v56, %v1015_v16 }
  0x6f   :  { %v298_v6 = vadd.f32 %v297_v46, %v296_v45  ;;  %v311_v7 = vsub.f32 %v968_v38, %v186_v51  ;;  %v312_v8 = vmul.f32 %v309_v49, %v309_v49  ;;  %v313_v9 = vmul.f32 %v310_v50, %v310_v50  ;;  %v88_v45 = vld [vmem:[#allocation2 + $0x10] sm:$0xff] }
  0x70   :  { %v1039_v11 = vadd.f32 %v283_v40, %v282_v54  ;;  %v325_v12 = vsub.f32 %v964_v28, %v154_v57  ;;  %v326_v13 = vsub.f32 %v966_v29, %v171_v58  ;;  %v339_v14 = vmin.f32 %v338_v4, %v1025_v39  ;;  %v86_v40 = vld [vmem:[#allocation2 + $0x8] sm:$0xff] }
  0x71   :  { %v1044_v17 = vadd.f32 %v291_v55, %v290_v59  ;;  %v306_v18 = vadd.f32 %v305_v62, %v304_v61  ;;  %v307_v19 = vmul.f32 %v303_v60, %v303_v60  ;;  %v319_v20 = vsub.f32 %v968_v38, %v187_v5  ;;  %v189_v60 = vld [vmem:[#allocation8] sm:$0xff] }
  0x72   :  { %v320_v21 = vmul.f32 %v317_v2, %v317_v2  ;;  %v321_v22 = vmul.f32 %v318_v3, %v318_v3  ;;  %v340_v23 = vmin.f32 %v339_v14, %v1031_v53  ;;  %v1048_v24 = vadd.f32 %v299_v1, %v298_v6  ;;  %v191_v14 = vld [vmem:[#allocation8 + $0x10] sm:$0xff] }
  0x73   :  { %v314_v25 = vadd.f32 %v313_v9, %v312_v8  ;;  %v315_v26 = vmul.f32 %v311_v7, %v311_v7  ;;  %v327_v27 = vsub.f32 %v968_v38, %v188_v15  ;;  %v328_v30 = vmul.f32 %v325_v12, %v325_v12 }
  0x74   :  { %v329_v31 = vmul.f32 %v326_v13, %v326_v13  ;;  %v341_v32 = vmin.f32 %v340_v23, %v1039_v11  ;;  %v1052_v33 = vadd.f32 %v307_v19, %v306_v18  ;;  %v322_v34 = vadd.f32 %v321_v22, %v320_v21  ;;  %v192_v21 = vld [vmem:[#allocation8 + $0x18] sm:$0xff] }
  0x75   :  { %v323_v35 = vmul.f32 %v319_v20, %v319_v20  ;;  %v1055_v41 = vadd.f32 %v315_v26, %v314_v25  ;;  %v331_v43 = vmul.f32 %v327_v27, %v327_v27  ;;  %v602_v50 = vsub.f32 %v964_v28, %v84_v37 }
  0x76   :  { %v342_v36 = vmin.f32 %v341_v32, %v1044_v17  ;;  %v330_v42 = vadd.f32 %v329_v31, %v328_v30  ;;  %v603_v51 = vsub.f32 %v966_v29, %v86_v40  ;;  %v127_v54 = vlaneseq  ;;  %v190_v29 = vld [vmem:[#allocation8 + $0x8] sm:$0xff] }
  0x77   :  { %v1058_v46 = vadd.f32 %v323_v35, %v322_v34  ;;  %v604_v57 = vsub.f32 %v968_v38, %v88_v45  ;;  %v605_v58 = vmul.f32 %v602_v50, %v602_v50  ;;  %vm352_vm0 = vcmp.lt.f32.partialorder %v993_v47, 1.0 }
  0x78   :  { %v343_v44 = vmin.f32 %v342_v36, %v1048_v24  ;;  %v1063_v55 = vadd.f32 %v331_v43, %v330_v42  ;;  %v606_v59 = vmul.f32 %v603_v51, %v603_v51  ;;  %v128_v2 = vshrl.u32 %v127_v54, 7  ;;  %v193_v42 = vld [vmem:[#allocation8 + $0x20] sm:$0xff] }
  0x79   :  { %v608_v1 = vmul.f32 %v604_v57, %v604_v57  ;;  %v701_v28 = vadd.f32 -10000.0, %v189_v60  ;;  %v130_v5 = vand.u32 127, %v127_v54  ;;  %vm361_vm8 = vcmp.lt.f32.partialorder %v995_v48, 1.0 }
  0x7a   :  { %v344_v49 = vmin.f32 %v343_v44, %v1052_v33  ;;  %v607_v62 = vadd.f32 %v606_v59, %v605_v58  ;;  %v131_v6 = vmul.u32 26, %v128_v2  ;;  %v702_v12 = vadd.f32 -10000.0, %v190_v29 }
  0x7b   :  { %vm372_vm15 = vcmp.lt.f32.partialorder %v999_v52, 1.0  ;;  %v703_v19 = vadd.f32 -10000.0, %v191_v14  ;;  %v704_v30 = vadd.f32 -10000.0, %v192_v21 }
  0x7c   :  { %v345_v56 = vmin.f32 %v344_v49, %v1055_v41  ;;  %v1081_v4 = vadd.f32 %v608_v1, %v607_v62  ;;  %v135_v13 = vadd.s32 %v131_v6, %v130_v5  ;;  %v194_v62 = vld [vmem:[#allocation8 + $0x28] sm:$0xff]  ;;  %v197_v49 = vld [vmem:[#allocation8 + $0x40] sm:$0xff] }
  0x7e   :  { %v346_v61 = vmin.f32 %v345_v56, %v1058_v46  ;;  %727 = vrsqrt.f32 %v1081_v4  ;;  %v615_v37 = vand.u32 2147483648, %v1081_v4  ;;  %v705_v56 = vadd.f32 -10000.0, %v193_v42 }
  0x80   :  { %v1069_v3 = vmin.f32 %v346_v61, %v1063_v55 }
  0x82   :  { %vm350_vm1 = vcmp.le.f32.partialorder %v993_v47, %v1069_v3  ;;  %vm357_vm4 = vcmp.le.f32.partialorder %v995_v48, %v1069_v3  ;;  %vm368_vm11 = vcmp.le.f32.partialorder %v999_v52, %v1069_v3  ;;  %v882_v52 = vmov 0.0  }
  0x83   :  { %vm1075_vm3 = vmxor %vm350_vm1, %vm881_vm2  ;;  %v706_v47 = vadd.f32 -10000.0, %v194_v62 }
  0x84   :  { %vm353_vm5 = vmand %vm352_vm0, %vm1075_vm3  ;;  %vm136_vm0 = vcmp.lt.s32.totalorder %v135_v13, 203  ;;  %v195_v13 = vld [vmem:[#allocation8 + $0x30] sm:$0xff] }
  0x85   :  { %v1085_v7 = vsel %vm353_vm5, %v701_v28, %v189_v60  ;;  %vm1089_vm6 = vmand %vm357_vm4, %vm1075_vm3  ;;  %vm348_vm5 = vcmp.lt.f32.partialorder %v1069_v3, 0.25  ;;  %v1144_v25 = vsel %vm136_vm0, 1.0, %v882_v52 }
  0x86   :  { %v356_v8 = vsel %vm350_vm1, %v1085_v7, 0.0  ;;  %vm1095_vm7 = vmxor %vm357_vm4, %vm881_vm2  ;;  %vm379_vm4 = vcmp.le.f32.partialorder %v1002_v63, %v1069_v3  ;;  %v1156_v31 = vsel %vm348_vm5, %v1144_v25, 0.0  ;;  %vm394_vm5 = vcmp.lt.f32.partialorder %v1004_v0, 1.0 }
  0x87   :  { %vm360_vm9 = vmand %vm1075_vm3, %vm1095_vm7  ;;  %vm383_vm7 = vcmp.lt.f32.partialorder %v1002_v63, 1.0 }
  0x88   :  { %vm362_vm10 = vmxor %vm1089_vm6, %vm881_vm2  ;;  %v728_v35 = vpop.eup %727 }
  0x89   :  { %vm363_vm12 = vmand %vm361_vm8, %vm362_vm10  ;;  %vm390_vm10 = vcmp.le.f32.partialorder %v1004_v0, %v1069_v3  ;;  %v611_v43 = vmul.f32 %v728_v35, %v1081_v4 }
  0x8a   :  { %v1110_v15 = vsel %vm363_vm12, %v702_v12, %v190_v29  ;;  %vm1117_vm13 = vmand %vm368_vm11, %vm360_vm9  ;;  %v199_v29 = vld [vmem:[#allocation8 + $0x50] sm:$0xff] }
  0x8b   :  { %v366_v18 = vsel %vm1089_vm6, %v1110_v15, 0.0  ;;  %vm370_vm14 = vmxor %vm368_vm11, %vm881_vm2  ;;  %v520_v20 = vmax.f32 %v1085_v7, %v1110_v15  ;;  %vm636_vm11 = vcmask 211968  }
  0x8c   :  { %v367_v22 = vadd.f32 %v366_v18, %v356_v8  ;;  %vm1133_vm1 = vmand %vm360_vm9, %vm370_vm14  ;;  %vm612_vm14 = vcmp.eq.f32.partialorder %v1081_v4, inf  ;;  %v637_v40 = vsel %vm636_vm11, %v1156_v31, 0.0 }
  0x8d   :  { %vm373_vm6 = vmxor %vm1117_vm13, %vm881_vm2  ;;  %v638_v44 = vrot.slane %v637_v40, 4  ;;  %v613_v50 = vsel %vm612_vm14, %v1081_v4, %v611_v43 }
  0x8e   :  { %vm374_vm8 = vmand %vm372_vm15, %vm373_vm6  ;;  %vm614_vm15 = vcmp.eq.f32.partialorder %v1081_v4, 0.0 }
  0x8f   :  { %v1146_v26 = vsel %vm374_vm8, %v703_v19, %v191_v14  ;;  %vm1150_vm3 = vmand %vm379_vm4, %vm1133_vm1  ;;  %v639_v63 = vadd.f32 %v638_v44, %v637_v40  ;;  %v616_v57 = vsel %vm614_vm15, %v615_v37, %v613_v50  ;;  %vm644_vm15 = vcmask 204800  }
  0x90   :  { %v377_v32 = vsel %vm1117_vm13, %v1146_v26, 0.0  ;;  %vm1162_vm9 = vmxor %vm379_vm4, %vm881_vm2  ;;  %v655_v61 = vmul.f32 %v616_v57, %v1156_v31 }
  0x91   :  { %v378_v36 = vadd.f32 %v377_v32, %v367_v22  ;;  %vm382_vm12 = vmand %vm1133_vm1, %vm1162_vm9  ;;  %v640_v60 = vrot.slane %v639_v63, 2  ;;  %vm405_vm9 = vcmp.lt.f32.partialorder %v1011_v10, 1.0  ;;  %v707_v22 = vadd.f32 -10000.0, %v195_v13 }
  0x92   :  { %vm384_vm13 = vmxor %vm1150_vm3, %vm881_vm2  ;;  %v656_v2 = vsel %vm636_vm11, %v655_v61, 0.0 }
  0x93   :  { %vm385_vm0 = vmand %vm383_vm7, %vm384_vm13  ;;  %v641_v1 = vadd.f32 %v640_v60, %v639_v63  ;;  %v657_v38 = vrot.slane %v656_v2, 4  ;;  %vm412_vm13 = vcmp.le.f32.partialorder %v1015_v16, %v1069_v3 }
  0x94   :  { %v1183_v45 = vsel %vm385_vm0, %v704_v30, %v192_v21  ;;  %vm1193_vm4 = vmand %vm390_vm10, %vm382_vm12  ;;  %v196_v30 = vld [vmem:[#allocation8 + $0x38] sm:$0xff] }
  0x95   :  { %v521_v51 = vmax.f32 %v1183_v45, %v1146_v26  ;;  %v388_v54 = vsel %vm1150_vm3, %v1183_v45, 0.0  ;;  %vm392_vm6 = vmxor %vm390_vm10, %vm881_vm2  ;;  %vm401_vm3 = vcmp.le.f32.partialorder %v1011_v10, %v1069_v3  ;;  %v642_v8 = vrot.slane %v641_v1, 1 }
  0x96   :  { %v389_v58 = vadd.f32 %v388_v54, %v378_v36  ;;  %vm1213_vm8 = vmand %vm382_vm12, %vm392_vm6  ;;  %v658_v12 = vadd.f32 %v657_v38, %v656_v2  ;;  %vm416_vm6 = vcmp.lt.f32.partialorder %v1015_v16, 1.0  ;;  %v708_v43 = vadd.f32 -10000.0, %v196_v30  ;;  %v96_v38 = vld [vmem:[#allocation2 + $0x30] sm:$0xff] }
  0x97   :  { %vm395_vm7 = vmxor %vm1193_vm4, %vm881_vm2  ;;  %v643_v14 = vadd.f32 %v642_v8, %v641_v1  ;;  %v709_v54 = vadd.f32 -10000.0, %v197_v49  ;;  %729 = vlog2.f32 %v96_v38 }
  0x98   :  { %vm396_vm10 = vmand %vm394_vm5, %vm395_vm7  ;;  %v659_v48 = vrot.slane %v658_v12, 2 }
  0x99   :  { %v1226_v28 = vsel %vm396_vm10, %v705_v56, %v193_v42  ;;  %vm1230_vm1 = vmand %vm401_vm3, %vm1213_vm8  ;;  %645 = vst.msk [vmem:[#allocation10] sm:$0x1] %vm644_vm15, %v643_v14  ;;  %vm423_vm10 = vcmp.le.f32.partialorder %v1025_v39, %v1069_v3 }
  0x9a   :  { %v522_v5 = vmax.f32 %v521_v51, %v1226_v28  ;;  %v399_v0 = vsel %vm1193_vm4, %v1226_v28, 0.0  ;;  %vm1240_vm12 = vmxor %vm401_vm3, %vm881_vm2  ;;  %v660_v23 = vadd.f32 %v659_v48, %v658_v12  ;;  %v200_v12 = vld [vmem:[#allocation8 + $0x58] sm:$0xff] }
  0x9b   :  { %v400_v9 = vadd.f32 %v399_v0, %v389_v58  ;;  %vm404_vm14 = vmand %vm1213_vm8, %vm1240_vm12  ;;  %vm427_vm12 = vcmp.lt.f32.partialorder %v1025_v39, 1.0  ;;  %v198_v58 = vld [vmem:[#allocation8 + $0x48] sm:$0xff] }
  0x9c   :  { %vm406_vm0 = vmxor %vm1230_vm1, %vm881_vm2  ;;  %v661_v32 = vrot.slane %v660_v23, 1  ;;  %v710_v1 = vadd.f32 -10000.0, %v198_v58 }
  0x9d   :  { %vm407_vm4 = vmand %vm405_vm9, %vm406_vm0  ;;  %vm434_vm0 = vcmp.le.f32.partialorder %v1031_v53, %v1069_v3 }
  0x9e   :  { %v1255_v18 = vsel %vm407_vm4, %v706_v47, %v194_v62  ;;  %vm1262_vm5 = vmand %vm412_vm13, %vm404_vm14  ;;  %v662_v36 = vadd.f32 %v661_v32, %v660_v23  ;;  %v711_v47 = vadd.f32 -10000.0, %v199_v29 }
  0x9f   :  { %v523_v21 = vmax.f32 %v522_v5, %v1255_v18  ;;  %v410_v10 = vsel %vm1230_vm1, %v1255_v18, 0.0  ;;  %vm414_vm3 = vmxor %vm412_vm13, %vm881_vm2 }
  0xa0   :  { %v411_v27 = vadd.f32 %v410_v10, %v400_v9  ;;  %vm1278_vm7 = vmand %vm404_vm14, %vm414_vm3  ;;  %663 = vst.msk [vmem:[#allocation10 + $0x2] sm:$0x1] %vm644_vm15, %v662_v36  ;;  %v712_v10 = vadd.f32 -10000.0, %v200_v12 }
  0xa1   :  { %vm417_vm1 = vmxor %vm1262_vm5, %vm881_vm2  ;;  %v730_v42 = vpop.eup %729 }
  0xa2   :  { %vm418_vm9 = vmand %vm416_vm6, %vm417_vm1  ;;  %vm445_vm1 = vcmp.le.f32.partialorder %v1039_v11, %v1069_v3  ;;  %v624_v57 = vmul.f32 0.6931472, %v730_v42 }
  0xa3   :  { %v1287_v34 = vsel %vm418_vm9, %v707_v22, %v195_v13  ;;  %vm1291_vm13 = vmand %vm423_vm10, %vm1278_vm7  ;;  %v626_v13 = vsub.f32 1.0, %v96_v38 }
  0xa4   :  { %v524_v37 = vmax.f32 %v523_v21, %v1287_v34  ;;  %v421_v40 = vsel %vm1262_vm5, %v1287_v34, 0.0  ;;  %vm1300_vm8 = vmxor %vm423_vm10, %vm881_vm2 }
  0xa5   :  { %v422_v44 = vadd.f32 %v421_v40, %v411_v27  ;;  %vm426_vm14 = vmand %vm1278_vm7, %vm1300_vm8  ;;  %vm438_vm7 = vcmp.lt.f32.partialorder %v1031_v53, 1.0  ;;  %731 = vlog2.f32 %v626_v13  ;;  %v204_v53 = vld [vmem:[#allocation8 + $0x78] sm:$0xff] }
  0xa6   :  { %vm428_vm4 = vmxor %vm1291_vm13, %vm881_vm2 }
  0xa7   :  { %vm429_vm5 = vmand %vm427_vm12, %vm428_vm4  ;;  %vm456_vm4 = vcmp.le.f32.partialorder %v1044_v17, %v1069_v3 }
  0xa8   :  { %v1315_v50 = vsel %vm429_vm5, %v708_v43, %v196_v30  ;;  %vm1317_vm6 = vmand %vm434_vm0, %vm426_vm14 }
  0xa9   :  { %v525_v63 = vmax.f32 %v524_v37, %v1315_v50  ;;  %v432_v51 = vsel %vm1291_vm13, %v1315_v50, 0.0  ;;  %vm436_vm3 = vmxor %vm434_vm0, %vm881_vm2  ;;  %v202_v37 = vld [vmem:[#allocation8 + $0x68] sm:$0xff] }
  0xaa   :  { %v433_v56 = vadd.f32 %v432_v51, %v422_v44  ;;  %vm1327_vm10 = vmand %vm426_vm14, %vm436_vm3  ;;  %vm449_vm14 = vcmp.lt.f32.partialorder %v1039_v11, 1.0  ;;  %v714_v39 = vadd.f32 -10000.0, %v202_v37 }
  0xab   :  { %vm439_vm9 = vmxor %vm1317_vm6, %vm881_vm2 }
  0xac   :  { %vm440_vm8 = vmand %vm438_vm7, %vm439_vm9  ;;  %vm467_vm9 = vcmp.le.f32.partialorder %v1048_v24, %v1069_v3 }
  0xad   :  { %v1336_v59 = vsel %vm440_vm8, %v709_v54, %v197_v49  ;;  %vm1340_vm13 = vmand %vm445_vm1, %vm1327_vm10  ;;  %v203_v54 = vld [vmem:[#allocation8 + $0x70] sm:$0xff] }
  0xae   :  { %v526_v60 = vmax.f32 %v525_v63, %v1336_v59  ;;  %v443_v61 = vsel %vm1317_vm6, %v1336_v59, 0.0  ;;  %vm1349_vm12 = vmxor %vm445_vm1, %vm881_vm2  ;;  %v715_v62 = vadd.f32 -10000.0, %v203_v54 }
  0xaf   :  { %v444_v2 = vadd.f32 %v443_v61, %v433_v56  ;;  %vm448_vm0 = vmand %vm1327_vm10, %vm1349_vm12  ;;  %vm460_vm10 = vcmp.lt.f32.partialorder %v1044_v17, 1.0  ;;  %v732_v63 = vpop.eup %731 }
  0xb0   :  { %vm450_vm5 = vmxor %vm1340_vm13, %vm881_vm2 }
  0xb1   :  { %vm451_vm6 = vmand %vm449_vm14, %vm450_vm5  ;;  %vm471_vm14 = vcmp.lt.f32.partialorder %v1048_v24, 1.0  ;;  %vm478_vm5 = vcmp.le.f32.partialorder %v1052_v33, %v1069_v3  ;;  %v201_v24 = vld [vmem:[#allocation8 + $0x60] sm:$0xff] }
  0xb2   :  { %v1363_v5 = vsel %vm451_vm6, %v710_v1, %v198_v58  ;;  %vm1365_vm3 = vmand %vm456_vm4, %vm448_vm0  ;;  %v713_v32 = vadd.f32 -10000.0, %v201_v24  ;;  %v628_v58 = vmul.f32 0.6931472, %v732_v63 }
  0xb3   :  { %v527_v0 = vmax.f32 %v526_v60, %v1363_v5  ;;  %v454_v6 = vsel %vm1340_vm13, %v1363_v5, 0.0  ;;  %vm458_vm7 = vmxor %vm456_vm4, %vm881_vm2 }
  0xb4   :  { %v455_v8 = vadd.f32 %v454_v6, %v444_v2  ;;  %vm1375_vm1 = vmand %vm448_vm0, %vm458_vm7 }
  0xb5   :  { %vm461_vm8 = vmxor %vm1365_vm3, %vm881_vm2 }
  0xb6   :  { %vm462_vm13 = vmand %vm460_vm10, %vm461_vm8  ;;  %vm489_vm8 = vcmp.le.f32.partialorder %v1055_v41, %v1069_v3 }
  0xb7   :  { %v1384_v14 = vsel %vm462_vm13, %v711_v47, %v199_v29  ;;  %vm1388_vm12 = vmand %vm467_vm9, %vm1375_vm1  ;;  %v625_v29 = vmax.f32 %v624_v57, -100.0 }
  0xb8   :  { %v528_v48 = vmax.f32 %v527_v0, %v1384_v14  ;;  %v465_v19 = vsel %vm1365_vm3, %v1384_v14, 0.0  ;;  %vm1398_vm0 = vmxor %vm467_vm9, %vm881_vm2 }
  0xb9   :  { %v466_v22 = vadd.f32 %v465_v19, %v455_v8  ;;  %vm470_vm4 = vmand %vm1375_vm1, %vm1398_vm0  ;;  %vm482_vm1 = vcmp.lt.f32.partialorder %v1052_v33, 1.0 }
  0xba   :  { %vm472_vm6 = vmxor %vm1388_vm12, %vm881_vm2 }
  0xbb   :  { %vm473_vm3 = vmand %vm471_vm14, %vm472_vm6  ;;  %vm500_vm6 = vcmp.le.f32.partialorder %v1058_v46, %v1069_v3 }
  0xbc   :  { %v1411_v23 = vsel %vm473_vm3, %v712_v10, %v200_v12  ;;  %vm1413_vm7 = vmand %vm478_vm5, %vm470_vm4 }
  0xbd   :  { %v529_v16 = vmax.f32 %v528_v48, %v1411_v23  ;;  %v476_v30 = vsel %vm1388_vm12, %v1411_v23, 0.0  ;;  %vm480_vm10 = vmxor %vm478_vm5, %vm881_vm2 }
  0xbe   :  { %v477_v35 = vadd.f32 %v476_v30, %v466_v22  ;;  %vm1423_vm9 = vmand %vm470_vm4, %vm480_vm10  ;;  %vm493_vm4 = vcmp.lt.f32.partialorder %v1055_v41, 1.0 }
  0xbf   :  { %vm483_vm13 = vmxor %vm1413_vm7, %vm881_vm2 }
  0xc0   :  { %vm484_vm14 = vmand %vm482_vm1, %vm483_vm13 }
  0xc1   :  { %v1432_v40 = vsel %vm484_vm14, %v713_v32, %v201_v24  ;;  %vm1436_vm12 = vmand %vm489_vm8, %vm1423_vm9 }
  0xc2   :  { %v530_v43 = vmax.f32 %v529_v16, %v1432_v40  ;;  %v487_v44 = vsel %vm1413_vm7, %v1432_v40, 0.0  ;;  %vm1445_vm0 = vmxor %vm489_vm8, %vm881_vm2  ;;  %vm617_vm7 = vcmp.lt.f32.partialorder %v1081_v4, 0.25  ;;  %vm504_vm8 = vcmp.lt.f32.partialorder %v1058_v46, 1.0 }
  0xc3   :  { %v488_v51 = vadd.f32 %v487_v44, %v477_v35  ;;  %vm492_vm5 = vmand %vm1423_vm9, %vm1445_vm0  ;;  %v717_v1 = vsel %vm617_vm7, 1.0, %v882_v52  ;;  %v716_v46 = vadd.f32 -10000.0, %v204_v53  ;;  %v629_v52 = vmax.f32 %v628_v58, -100.0 }
  0xc4   :  { %vm494_vm3 = vmxor %vm1436_vm12, %vm881_vm2  ;;  %v632_v38 = vsub.f32 1.0, %v717_v1  ;;  %vm618_vm9 = vcmp.lt.f32.partialorder %v1081_v4, 1.0  ;;  %v631_v47 = vmul.f32 %v717_v1, %v625_v29 }
  0xc5   :  { %vm495_vm10 = vmand %vm493_vm4, %vm494_vm3  ;;  %vm511_vm4 = vcmp.le.f32.partialorder %v1063_v55, %v1069_v3 }
  0xc6   :  { %v1460_v41 = vsel %vm495_vm10, %v714_v39, %v202_v37  ;;  %vm1467_vm1 = vmand %vm500_vm6, %vm492_vm5  ;;  %v633_v8 = vmul.f32 %v632_v38, %v629_v52 }
  0xc7   :  { %v531_v60 = vmax.f32 %v530_v43, %v1460_v41  ;;  %v498_v61 = vsel %vm1436_vm12, %v1460_v41, 0.0  ;;  %vm502_vm13 = vmxor %vm500_vm6, %vm881_vm2  ;;  %vm513_vm6 = vcmp.lt.f32.partialorder %v1063_v55, 1.0 }
  0xc8   :  { %v499_v2 = vadd.f32 %v498_v61, %v488_v51  ;;  %vm503_vm14 = vmand %vm492_vm5, %vm502_vm13  ;;  %v634_v21 = vadd.f32 %v633_v8, %v631_v47 }
  0xc9   :  { %vm505_vm12 = vmxor %vm1467_vm1, %vm881_vm2 }
  0xca   :  { %vm506_vm3 = vmand %vm504_vm8, %vm505_vm12 }
  0xcb   :  { %v1491_v11 = vsel %vm506_vm3, %v715_v62, %v203_v54  ;;  %vm512_vm10 = vmand %vm511_vm4, %vm503_vm14 }
  0xcc   :  { %v532_v0 = vmax.f32 %v531_v60, %v1491_v11  ;;  %v509_v3 = vsel %vm1467_vm1, %v1491_v11, 0.0  ;;  %vm514_vm0 = vmxor %vm512_vm10, %vm881_vm2 }
  0xcd   :  { %v510_v6 = vadd.f32 %v509_v3, %v499_v2  ;;  %vm515_vm5 = vmand %vm513_vm6, %vm514_vm0 }
  0xce   :  { %v1499_v55 = vsel %vm515_vm5, %v716_v46, %v204_v53  ;;  %vm619_vm8 = vmxor %vm617_vm7, %vm618_vm9 }
  0xcf   :  { %v533_v9 = vmax.f32 %v532_v0, %v1499_v55  ;;  %v518_v12 = vsel %vm512_vm10, %v1499_v55, 0.0  ;;  %v620_v13 = vsel %vm619_vm8, 0.0, %v1144_v25 }
  0xd0   :  { %v1506_v17 = vadd.f32 %v518_v12, %v510_v6  ;;  %v630_v19 = vsub.f32 0.0, %v620_v13 }
  0xd1   :  { %v1511_v48 = vmax.f32 %v533_v9, %v520_v20 }
  0xd3   :  { %v535_v4 = vsub.f32 %v1085_v7, %v1511_v48  ;;  %v538_v10 = vsub.f32 %v1110_v15, %v1511_v48  ;;  %v542_v22 = vsub.f32 %v1146_v26, %v1511_v48  ;;  %v546_v25 = vsub.f32 %v1183_v45, %v1511_v48 }
  0xd4   :  { %v550_v24 = vsub.f32 %v1226_v28, %v1511_v48  ;;  %v554_v20 = vsub.f32 %v1255_v18, %v1511_v48  ;;  %v558_v27 = vsub.f32 %v1287_v34, %v1511_v48  ;;  %v562_v7 = vsub.f32 %v1315_v50, %v1511_v48 }
  0xd5   :  { %v536_v16 = vmul.f32 1.442695, %v535_v4  ;;  %v539_v15 = vmul.f32 1.442695, %v538_v10  ;;  %v543_v30 = vmul.f32 1.442695, %v542_v22  ;;  %v566_v26 = vsub.f32 %v1336_v59, %v1511_v48 }
  0xd6   :  { %v547_v32 = vmul.f32 1.442695, %v546_v25  ;;  %v570_v45 = vsub.f32 %v1363_v5, %v1511_v48  ;;  %v635_v28 = vmul.f32 %v634_v21, %v630_v19  ;;  %v551_v18 = vmul.f32 1.442695, %v550_v24 }
  0xd7   :  { %733 = vpow2.f32 %v536_v16  ;;  %v574_v34 = vsub.f32 %v1384_v14, %v1511_v48  ;;  %v578_v50 = vsub.f32 %v1411_v23, %v1511_v48  ;;  %v582_v35 = vsub.f32 %v1432_v40, %v1511_v48 }
  0xd8   :  { %735 = vpow2.f32 %v539_v15  ;;  %v586_v59 = vsub.f32 %v1460_v41, %v1511_v48  ;;  %v590_v5 = vsub.f32 %v1491_v11, %v1511_v48  ;;  %v555_v36 = vmul.f32 1.442695, %v554_v20 }
  0xd9   :  { %737 = vpow2.f32 %v543_v30  ;;  %v594_v37 = vsub.f32 %v1499_v55, %v1511_v48  ;;  %v559_v14 = vmul.f32 1.442695, %v558_v27  ;;  %v664_v33 = vsel %vm636_vm11, %v635_v28, 0.0 }
  0xda   :  { %739 = vpow2.f32 %v547_v32  ;;  %v665_v23 = vrot.slane %v664_v33, 4  ;;  %v563_v42 = vmul.f32 1.442695, %v562_v7  ;;  %v567_v40 = vmul.f32 1.442695, %v566_v26 }
  0xdb   :  { %741 = vpow2.f32 %v551_v18  ;;  %v571_v63 = vmul.f32 1.442695, %v570_v45  ;;  %v575_v57 = vmul.f32 1.442695, %v574_v34  ;;  %v579_v61 = vmul.f32 1.442695, %v578_v50 }
  0xdc   :  { %743 = vpow2.f32 %v555_v36  ;;  %v666_v43 = vadd.f32 %v665_v23, %v664_v33  ;;  %v583_v46 = vmul.f32 1.442695, %v582_v35  ;;  %v587_v38 = vmul.f32 1.442695, %v586_v59 }
  0xdd   :  { %745 = vpow2.f32 %v559_v14  ;;  %v591_v3 = vmul.f32 1.442695, %v590_v5  ;;  %v595_v47 = vmul.f32 1.442695, %v594_v37 }
  0xde   :  { %v667_v49 = vrot.slane %v666_v43, 2  ;;  %747 = vpow2.f32 %v563_v42 }
  0xdf   :  { %749 = vpow2.f32 %v567_v40 }
  0xe0   :  { %v668_v41 = vadd.f32 %v667_v49, %v666_v43  ;;  %751 = vpow2.f32 %v571_v63 }
  0xe1   :  { %v734_v44 = vpop.eup %733  ;;  %753 = vpow2.f32 %v575_v57 }
  0xe2   :  { %v736_v39 = vpop.eup %735  ;;  %v669_v53 = vrot.slane %v668_v41, 1  ;;  %755 = vpow2.f32 %v579_v61 }
  0xe3   :  { %v738_v51 = vpop.eup %737  ;;  %v541_v54 = vadd.f32 %v736_v39, %v734_v44  ;;  %757 = vpow2.f32 %v583_v46 }
  0xe4   :  { %v740_v56 = vpop.eup %739  ;;  %v670_v1 = vadd.f32 %v669_v53, %v668_v41  ;;  %759 = vpow2.f32 %v587_v38 }
  0xe5   :  { %v545_v58 = vadd.f32 %v738_v51, %v541_v54  ;;  %v742_v60 = vpop.eup %741  ;;  %761 = vpow2.f32 %v591_v3 }
  0xe6   :  { %v744_v2 = vpop.eup %743  ;;  %671 = vst.msk [vmem:[#allocation10 + $0x3] sm:$0x1] %vm644_vm15, %v670_v1  ;;  %763 = vpow2.f32 %v595_v47 }
  0xe7   :  { %v549_v62 = vadd.f32 %v740_v56, %v545_v58  ;;  %v746_v52 = vpop.eup %745 }
  0xe8   :  { %v748_v0 = vpop.eup %747 }
  0xe9   :  { %v553_v29 = vadd.f32 %v742_v60, %v549_v62  ;;  %v750_v55 = vpop.eup %749 }
  0xea   :  { %v752_v9 = vpop.eup %751 }
  0xeb   :  { %v557_v11 = vadd.f32 %v744_v2, %v553_v29  ;;  %v754_v13 = vpop.eup %753 }
  0xec   :  { %v756_v21 = vpop.eup %755 }
  0xed   :  { %v561_v6 = vadd.f32 %v746_v52, %v557_v11  ;;  %v758_v10 = vpop.eup %757 }
  0xee   :  { %v760_v25 = vpop.eup %759 }
  0xef   :  { %v565_v8 = vadd.f32 %v748_v0, %v561_v6  ;;  %v762_v20 = vpop.eup %761 }
  0xf0   :  { %v764_v7 = vpop.eup %763 }
  0xf1   :  { %v569_v12 = vadd.f32 %v750_v55, %v565_v8 }
  0xf3   :  { %v573_v19 = vadd.f32 %v752_v9, %v569_v12 }
  0xf5   :  { %v577_v4 = vadd.f32 %v754_v13, %v573_v19 }
  0xf7   :  { %v581_v22 = vadd.f32 %v756_v21, %v577_v4 }
  0xf9   :  { %v585_v24 = vadd.f32 %v758_v10, %v581_v22 }
  0xfb   :  { %v589_v27 = vadd.f32 %v760_v25, %v585_v24 }
  0xfd   :  { %v593_v16 = vadd.f32 %v762_v20, %v589_v27 }
  0xff   :  { %v597_v15 = vadd.f32 %v764_v7, %v593_v16 }
 0x101   :  { %765 = vlog2.f32 %v597_v15 }
 0x10b   :  { %v766_v30 = vpop.eup %765 }
 0x10c   :  { %v599_v26 = vmul.f32 0.6931472, %v766_v30 }
 0x10e   :  { %v600_v32 = vadd.f32 %v599_v26, %v1511_v48 }
 0x110   :  { %v601_v45 = vsub.f32 %v600_v32, %v1506_v17 }
 0x112   :  { %v646_v28 = vmul.f32 %v601_v45, %v1156_v31 }
 0x114   :  { %v647_v18 = vsel %vm636_vm11, %v646_v28, 0.0 }
 0x115   :  { %v648_v34 = vrot.slane %v647_v18, 4 }
 0x117   :  { %v649_v50 = vadd.f32 %v648_v34, %v647_v18 }
 0x119   :  { %v650_v35 = vrot.slane %v649_v50, 2 }
 0x11b   :  { %v651_v59 = vadd.f32 %v650_v35, %v649_v50 }
 0x11d   :  { %v652_v5 = vrot.slane %v651_v59, 1 }
 0x11f   :  { %v653_v36 = vadd.f32 %v652_v5, %v651_v59 }
 0x121   :  { %654 = vst.msk [vmem:[#allocation10 + $0x1] sm:$0x1] %vm644_vm15, %v653_v36 }
 0x122   :  { %856 = shalt.err (!%p853_p5)
}
 0x123   :  { %s857_s19 = scalar_lea.hbm %s1568_s4, 64 }
 0x124   :  { %p858_p6 = scmp.ne.s32.totalorder %s1568_s4, %s857_s19  ;;  %p861_p7 = scmp.lt.u32.totalorder %s857_s19, %s1568_s4 }
 0x126   :  { %p863_p8 = pnand %p861_p7, %p858_p6 }
 0x128   :  { %866 = shalt.err (!%p863_p8)
}
 0x129   :  { %681 = dma.vmem_to_hbm [thread:$0]  %s679_s14, 64, %s1568_s4, [#allocation4]  }
 0x12a   :  { %873 = dma.done.wait [#allocation4], 64  }
 0x12b   :  { %874 = vsyncadd [#allocation4], 4294967232 }
 0x12c   :  { %685 = vsyncpa [#allocation3], 1 }
 0x12d   :  { %686 = vsyncpa [#allocation7], 1 }
 0x12e   :  { %687 = vsyncpa [#allocation4], 1 }
 0x12f   :  { %688 = vsyncpa [#allocation5], 1 }

</bundles_post_ra>
